<compile_context>
chip_gen: v7x
topology: tpu7x:2x2x1
jax: 0.10.0
libtpu: 0.0.40
codegen_flags: <defaults>
</compile_context>

<pallas_src>
import jax
import jax.numpy as jnp
from jax.experimental import pallas as pl
from jax.experimental.pallas import tpu as pltpu

# ----------------------------- MANO constants -------------------------------
REORDER = [0, 13, 14, 15, 16, 1, 2, 3, 17, 4, 5, 6, 18, 10, 11, 12, 19, 7, 8, 9, 20]
TIPS_IDS = [744, 320, 443, 555, 672]          # kpId2vertices values (insertion order)
PARENTS = [-1, 0, 1, 2, 0, 4, 5, 0, 7, 8, 0, 10, 11, 0, 13, 14]

NUM_JOINTS = 16
NUM_SHAPE = 10
NUM_POSE_FEAT = 135                           # 15 joints * 9 rot-mat entries
NUM_BLEND = NUM_SHAPE + NUM_POSE_FEAT         # 145


# ----------------------------- fused Pallas kernel --------------------------

def _mano_fused_kernel(coeffs_ref, gT_ref, vtemp_ref, dirs_ref, wT_ref, jregT_ref,
                       verts_ref, jreg_ref):
    """Per-batch fused: blendshapes -> LBS -> posed-vertex joint regression.

    Layout inside the kernel: vertices are lane-dense, V on the last (lane) axis.
      coeffs_ref : (1, 1, 145)   [betas | pose_feature]
      gT_ref     : (1, 16, 16)   G_flat[b]^T  (e, j)
      vtemp_ref  : (3, V)        v_template^T            (VMEM-resident param)
      dirs_ref   : (3, 145, V)   stacked shape+pose dirs (VMEM-resident param)
      wT_ref     : (16, V)       skinning weights^T      (VMEM-resident param)
      jregT_ref  : (V, 16)       J_regressor^T           (VMEM-resident param)
      verts_ref  : (1, 3, V)     posed, skinned (uncentered) vertices
      jreg_ref   : (1, 3, 16)    J_regressor @ verts (uncentered)
    """
    coeffs = coeffs_ref[0]                                   # (1, 145)
    vtemp = vtemp_ref[...]                                   # (3, V)

    # Blendshape offsets (shape + pose merged), one MXU matmul per xyz channel.
    vpx = vtemp[0:1] + jnp.dot(coeffs, dirs_ref[0], preferred_element_type=jnp.float32)
    vpy = vtemp[1:2] + jnp.dot(coeffs, dirs_ref[1], preferred_element_type=jnp.float32)
    vpz = vtemp[2:3] + jnp.dot(coeffs, dirs_ref[2], preferred_element_type=jnp.float32)

    # Per-vertex flattened 4x4 transforms, lane-dense over V:
    #   T[e, v] = sum_j G_flat[b, j, e] * weights[v, j]  == (weights @ G_flat[b])[v, e]
    T = jnp.dot(gT_ref[0], wT_ref[...], preferred_element_type=jnp.float32)   # (16, V)

    # LBS apply (homogeneous coordinate == 1).
    rows = []
    for c in range(3):
        rows.append(T[4 * c + 0:4 * c + 1] * vpx
                    + T[4 * c + 1:4 * c + 2] * vpy
                    + T[4 * c + 2:4 * c + 3] * vpz
                    + T[4 * c + 3:4 * c + 4])
    verts = jnp.concatenate(rows, axis=0)                    # (3, V)
    verts_ref[0] = verts

    # Posed-vertex joint regression epilogue: (3, V) @ (V, 16) -> (3, 16).
    jreg_ref[0] = jnp.dot(verts, jregT_ref[...], preferred_element_type=jnp.float32)


def _mano_fused(blend_coeffs, G_T, params):
    """blend_coeffs: (B, 145), G_T: (B, 16, 16). Returns (B,3,V) verts, (B,3,16) jreg."""
    B, K = blend_coeffs.shape
    V = params['vtemp_T'].shape[1]
    coeffs3 = blend_coeffs.reshape(B, 1, K).astype(jnp.float32)

    return pl.pallas_call(
        _mano_fused_kernel,
        out_shape=(jax.ShapeDtypeStruct((B, 3, V), jnp.float32),
                   jax.ShapeDtypeStruct((B, 3, NUM_JOINTS), jnp.float32)),
        grid=(B,),
        in_specs=[
            pl.BlockSpec((1, 1, K), lambda b: (b, 0, 0)),                    # coeffs
            pl.BlockSpec((1, NUM_JOINTS, NUM_JOINTS), lambda b: (b, 0, 0)),  # G^T
            pl.BlockSpec((3, V), lambda b: (0, 0)),                          # v_template^T
            pl.BlockSpec((3, K, V), lambda b: (0, 0, 0)),                    # stacked dirs
            pl.BlockSpec((NUM_JOINTS, V), lambda b: (0, 0)),                 # weights^T
            pl.BlockSpec((V, NUM_JOINTS), lambda b: (0, 0)),                 # J_regressor^T
        ],
        out_specs=(pl.BlockSpec((1, 3, V), lambda b: (b, 0, 0)),
                   pl.BlockSpec((1, 3, NUM_JOINTS), lambda b: (b, 0, 0))),
        compiler_params=pltpu.CompilerParams(dimension_semantics=("parallel",)),
    )(coeffs3, G_T.astype(jnp.float32), params['vtemp_T'],
      params['dirs'], params['weights_T'], params['jreg_T'])


# ----------------------------- parameter preparation (once) -----------------

def prepare_params(raw):
    """Hoist all per-forward re-layouts / transposes out of the forward pass."""
    shapedirs = raw['shapedirs'].astype(jnp.float32)      # (V, 3, 10)
    posedirs = raw['posedirs'].astype(jnp.float32)        # (V, 3, 135)
    jreg = raw['J_regressor'].astype(jnp.float32)         # (16, V)
    weights = raw['weights'].astype(jnp.float32)          # (V, 16)
    v_template = raw['v_template'].astype(jnp.float32)    # (V, 3)

    dirs = jnp.concatenate([jnp.transpose(shapedirs, (1, 2, 0)),
                            jnp.transpose(posedirs, (1, 2, 0))], axis=1)   # (3, 145, V)

    return {
        'comps': raw['comps'].astype(jnp.float32),                         # (ncomps, 45)
        'hands_mean': raw['hands_mean'].astype(jnp.float32),               # (45,)
        'dirs': dirs,                                                      # (3, 145, V)
        'vtemp_T': jnp.transpose(v_template),                              # (3, V)
        'weights_T': jnp.transpose(weights),                               # (16, V)
        'jreg_T': jnp.transpose(jreg),                                     # (V, 16)
        'jreg_rowsum': jnp.sum(jreg, axis=1),                              # (16,)
        # rest-joint regression folded through the (linear) shape blendshapes
        'J_template': jnp.dot(jreg, v_template),                           # (16, 3)
        'J_shapedirs': jnp.einsum('jv,vcs->jcs', jreg, shapedirs),         # (16, 3, 10)
    }


# ----------------------------- plain-JAX glue --------------------------------

def _rodrigues(rvec):
    """Axis-angle (..., 3) -> rotation matrices (..., 3, 3)."""
    angle = jnp.sqrt(jnp.sum(rvec * rvec, axis=-1, keepdims=True) + 1e-8)
    axis = rvec / angle
    c = jnp.cos(angle)[..., None]
    s = jnp.sin(angle)[..., None]
    rx, ry, rz = axis[..., 0], axis[..., 1], axis[..., 2]
    z = jnp.zeros_like(rx)
    K = jnp.stack([z, -rz, ry, rz, z, -rx, -ry, rx, z], axis=-1)
    K = K.reshape(rvec.shape[:-1] + (3, 3))
    eye = jnp.eye(3, dtype=rvec.dtype)
    outer = axis[..., :, None] * axis[..., None, :]
    return c * eye + (1.0 - c) * outer + s * K


def mano_forward(params, pose_coeffs, betas, center_idx):
    B = pose_coeffs.shape[0]
    betas = betas.astype(jnp.float32)
    pose_coeffs = pose_coeffs.astype(jnp.float32)

    # PCA pose -> full axis-angle pose (tiny; plain JAX)
    root_rot = pose_coeffs[:, :3]
    full_hand_pose = params['hands_mean'][None, :] + pose_coeffs[:, 3:] @ params['comps']
    full_poses = jnp.concatenate([root_rot, full_hand_pose], axis=1)       # (B, 48)
    rot_mats = _rodrigues(full_poses.reshape(B, NUM_JOINTS, 3))            # (B,16,3,3)

    # Rest joints via regressor-folded shape blendshapes (tiny; plain JAX)
    J = params['J_template'][None] + jnp.einsum('bs,jcs->bjc', betas,
                                                params['J_shapedirs'])     # (B,16,3)

    # Kinematic chain: tiny sequential 4x4 products (plain JAX)
    bottom = jnp.tile(jnp.array([[[0.0, 0.0, 0.0, 1.0]]], jnp.float32), (B, 1, 1))
    transforms = []
    for k in range(NUM_JOINTS):
        t = J[:, k] if PARENTS[k] < 0 else J[:, k] - J[:, PARENTS[k]]
        Tk = jnp.concatenate(
            [jnp.concatenate([rot_mats[:, k], t[:, :, None]], axis=2), bottom], axis=1)
        transforms.append(Tk if PARENTS[k] < 0
                          else jnp.matmul(transforms[PARENTS[k]], Tk))
    transforms_abs = jnp.stack(transforms, axis=1)                         # (B,16,4,4)
    posed_joints = transforms_abs[:, :, :3, 3]                             # (B,16,3)

    # Relative skinning transforms G = A * [[I, -J],[0, 1]]
    J_h = jnp.concatenate([J, jnp.zeros((B, NUM_JOINTS, 1), jnp.float32)], axis=-1)
    corr = jnp.einsum('bkij,bkj->bki', transforms_abs, J_h)
    G = transforms_abs - jnp.concatenate(
        [jnp.zeros((B, NUM_JOINTS, 4, 3), jnp.float32), corr[..., None]], axis=-1)
    G_T = jnp.transpose(G.reshape(B, NUM_JOINTS, 16), (0, 2, 1))           # (B,16,16)

    # Merged blendshape coefficients: [betas | pose_feature]
    pose_feature = (rot_mats[:, 1:] - jnp.eye(3, dtype=jnp.float32)).reshape(B, NUM_POSE_FEAT)
    blend_coeffs = jnp.concatenate([betas, pose_feature], axis=1)          # (B, 145)

    # Fused Pallas kernel (blendshapes + weights@G + LBS + joint regression)
    verts_3v, jreg_3j = _mano_fused(blend_coeffs, G_T, params)
    verts_unc = jnp.transpose(verts_3v, (0, 2, 1))                         # (B, V, 3)
    jreg16_unc = jnp.transpose(jreg_3j, (0, 2, 1))                         # (B, 16, 3)

    reorder = jnp.array(REORDER)
    tips_ids = jnp.array(TIPS_IDS)

    # --- ManoLayer output: 21 joints + centering (plain JAX; fused by XLA) ---
    tips_unc = verts_unc[:, tips_ids]
    joints21_unc = jnp.concatenate([posed_joints, tips_unc], axis=1)[:, reorder]
    if center_idx is not None:
        center_layer = joints21_unc[:, center_idx:center_idx + 1]          # (B,1,3)
    else:
        center_layer = jnp.zeros((B, 1, 3), jnp.float32)
    verts_layer = verts_unc - center_layer                                 # mano_output.verts
    joints_layer = joints21_unc - center_layer                             # mano_output.joints

    # --- MANO wrapper: regressed joints from the (centered) vertices ---
    #   J_reg @ (verts - c) == (J_reg @ verts) - rowsum(J_reg) * c
    jreg16 = jreg16_unc - params['jreg_rowsum'][None, :, None] * center_layer
    tips_w = verts_layer[:, tips_ids]
    joints_reg = jnp.concatenate([jreg16, tips_w], axis=1)[:, reorder]     # (B, 21, 3)
    if center_idx is not None:
        center_joint_reg = joints_reg[:, center_idx:center_idx + 1]
    else:
        center_joint_reg = jnp.zeros_like(joints_reg[:, 0:1])
    verts_rel = verts_layer - center_joint_reg
    joints_reg_rel = joints_reg - center_joint_reg

    return {
        '_joints_rel': joints_layer,
        '_verts_rel': verts_layer,
        'verts_rel': verts_rel,
        'joints_reg_rel': joints_reg_rel,
        'center_idx': center_idx,
        'center_joints_reg': center_joint_reg,
        'full_poses': full_poses,
        'betas': betas,
        'rot_abs': transforms_abs[:, :, :3, :3],
    }


# ----------------------------- main ------------------------------------------

if __name__ == "__main__":
    V, NJ, NCOMPS, B = 778, 16, 6, 2   # 778 verts / 16 joints fixed by MANO topology
    center_idx = 9

    key = jax.random.PRNGKey(0)
    ks = jax.random.split(key, 9)

    # Deterministic synthetic MANO parameters (no checkpoint loading).
    jr = jnp.abs(jax.random.normal(ks[3], (NJ, V), jnp.float32))
    w = jnp.abs(jax.random.normal(ks[4], (V, NJ), jnp.float32))
    raw_params = {
        'v_template': 0.1 * jax.random.normal(ks[0], (V, 3), jnp.float32),
        'shapedirs': 0.01 * jax.random.normal(ks[1], (V, 3, 10), jnp.float32),
        'posedirs': 0.001 * jax.random.normal(ks[2], (V, 3, 135), jnp.float32),
        'J_regressor': jr / jnp.sum(jr, axis=1, keepdims=True),     # rows sum to 1
        'weights': w / jnp.sum(w, axis=1, keepdims=True),           # rows sum to 1
        'hands_mean': 0.1 * jax.random.normal(ks[5], (45,), jnp.float32),
        'comps': jax.random.normal(ks[6], (NCOMPS, 45), jnp.float32),
    }
    params = prepare_params(raw_params)

    pose_coeffs = 0.1 * jax.random.normal(ks[7], (B, 3 + NCOMPS), jnp.float32)
    betas = 0.1 * jax.random.normal(ks[8], (B, 10), jnp.float32)

    forward = jax.jit(mano_forward, static_argnames=('center_idx',))
    results = forward(params, pose_coeffs, betas, center_idx=center_idx)
    jax.block_until_ready((results['verts_rel'], results['joints_reg_rel'],
                           results['rot_abs'], results['full_poses']))

    assert results['verts_rel'].shape == (B, V, 3)
    assert results['_verts_rel'].shape == (B, V, 3)
    assert results['joints_reg_rel'].shape == (B, 21, 3)
    assert results['_joints_rel'].shape == (B, 21, 3)
    assert results['center_joints_reg'].shape == (B, 1, 3)
    assert results['rot_abs'].shape == (B, 16, 3, 3)
    assert results['full_poses'].shape == (B, 48)
    assert results['betas'].shape == (B, 10)

    print("KERNEL_OK")
</pallas_src>

<mosaic_0001>
module attributes {stable_mosaic.version = 11 : i64} {
  func.func @_mano_fused_kernel(%arg0: i32, %arg1: memref<1x1x145xf32, #tpu.memory_space<vmem>>, %arg2: memref<1x16x16xf32, #tpu.memory_space<vmem>>, %arg3: memref<3x778xf32, #tpu.memory_space<vmem>>, %arg4: memref<3x145x778xf32, #tpu.memory_space<vmem>>, %arg5: memref<16x778xf32, #tpu.memory_space<vmem>>, %arg6: memref<778x16xf32, #tpu.memory_space<vmem>>, %arg7: memref<1x3x778xf32, #tpu.memory_space<vmem>>, %arg8: memref<1x3x16xf32, #tpu.memory_space<vmem>>) attributes {dimension_semantics = [#tpu.dimension_semantics<parallel>], iteration_bounds = array<i64: 2>, scalar_prefetch = 0 : i64, scratch_operands = 0 : i64, tpu.core_type = #tpu.core_type<tc>, window_params = [{transform_indices = @transform_0, window_bounds = array<i64: 1, 1, 145>}, {transform_indices = @transform_1, window_bounds = array<i64: 1, 16, 16>}, {pipeline_mode = #tpu.pipeline_mode<synchronous>, transform_indices = @transform_2, window_bounds = array<i64: 3, 778>}, {pipeline_mode = #tpu.pipeline_mode<synchronous>, transform_indices = @transform_3, window_bounds = array<i64: 3, 145, 778>}, {pipeline_mode = #tpu.pipeline_mode<synchronous>, transform_indices = @transform_4, window_bounds = array<i64: 16, 778>}, {pipeline_mode = #tpu.pipeline_mode<synchronous>, transform_indices = @transform_5, window_bounds = array<i64: 778, 16>}, {transform_indices = @transform_6, window_bounds = array<i64: 1, 3, 778>}, {transform_indices = @transform_7, window_bounds = array<i64: 1, 3, 16>}]} {
    %c0 = arith.constant 0 : index
    %c0_0 = arith.constant 0 : index
    %c0_1 = arith.constant 0 : index
    %0 = vector.load %arg1[%c0, %c0_0, %c0_1] : memref<1x1x145xf32, #tpu.memory_space<vmem>>, vector<1x1x145xf32>
    %1 = vector.shape_cast %0 : vector<1x1x145xf32> to vector<1x145xf32>
    %c0_2 = arith.constant 0 : index
    %c0_3 = arith.constant 0 : index
    %2 = vector.load %arg3[%c0_2, %c0_3] : memref<3x778xf32, #tpu.memory_space<vmem>>, vector<3x778xf32>
    %3 = vector.extract_strided_slice %2 {offsets = [0, 0], sizes = [1, 778], strides = [1, 1]} : vector<3x778xf32> to vector<1x778xf32>
    %c0_4 = arith.constant 0 : index
    %c0_5 = arith.constant 0 : index
    %c0_6 = arith.constant 0 : index
    %4 = vector.load %arg4[%c0_4, %c0_5, %c0_6] : memref<3x145x778xf32, #tpu.memory_space<vmem>>, vector<1x145x778xf32>
    %5 = vector.shape_cast %4 : vector<1x145x778xf32> to vector<145x778xf32>
    %cst = arith.constant dense<0.000000e+00> : vector<1x778xf32>
    %6 = tpu.matmul %1, %5, %cst {dimension_numbers = #tpu.dot_dimension_numbers<[1], [0], [0], [1], [0, 0, 1, 1], [], []>} : vector<1x145xf32>, vector<145x778xf32>, vector<1x778xf32> -> vector<1x778xf32>
    %7 = arith.addf %3, %6 : vector<1x778xf32>
    %8 = vector.extract_strided_slice %2 {offsets = [1, 0], sizes = [1, 778], strides = [1, 1]} : vector<3x778xf32> to vector<1x778xf32>
    %c1 = arith.constant 1 : index
    %c0_7 = arith.constant 0 : index
    %c0_8 = arith.constant 0 : index
    %9 = vector.load %arg4[%c1, %c0_7, %c0_8] : memref<3x145x778xf32, #tpu.memory_space<vmem>>, vector<1x145x778xf32>
    %10 = vector.shape_cast %9 : vector<1x145x778xf32> to vector<145x778xf32>
    %cst_9 = arith.constant dense<0.000000e+00> : vector<1x778xf32>
    %11 = tpu.matmul %1, %10, %cst_9 {dimension_numbers = #tpu.dot_dimension_numbers<[1], [0], [0], [1], [0, 0, 1, 1], [], []>} : vector<1x145xf32>, vector<145x778xf32>, vector<1x778xf32> -> vector<1x778xf32>
    %12 = arith.addf %8, %11 : vector<1x778xf32>
    %13 = vector.extract_strided_slice %2 {offsets = [2, 0], sizes = [1, 778], strides = [1, 1]} : vector<3x778xf32> to vector<1x778xf32>
    %c2 = arith.constant 2 : index
    %c0_10 = arith.constant 0 : index
    %c0_11 = arith.constant 0 : index
    %14 = vector.load %arg4[%c2, %c0_10, %c0_11] : memref<3x145x778xf32, #tpu.memory_space<vmem>>, vector<1x145x778xf32>
    %15 = vector.shape_cast %14 : vector<1x145x778xf32> to vector<145x778xf32>
    %cst_12 = arith.constant dense<0.000000e+00> : vector<1x778xf32>
    %16 = tpu.matmul %1, %15, %cst_12 {dimension_numbers = #tpu.dot_dimension_numbers<[1], [0], [0], [1], [0, 0, 1, 1], [], []>} : vector<1x145xf32>, vector<145x778xf32>, vector<1x778xf32> -> vector<1x778xf32>
    %17 = arith.addf %13, %16 : vector<1x778xf32>
    %c0_13 = arith.constant 0 : index
    %c0_14 = arith.constant 0 : index
    %c0_15 = arith.constant 0 : index
    %18 = vector.load %arg2[%c0_13, %c0_14, %c0_15] : memref<1x16x16xf32, #tpu.memory_space<vmem>>, vector<1x16x16xf32>
    %19 = vector.shape_cast %18 : vector<1x16x16xf32> to vector<16x16xf32>
    %c0_16 = arith.constant 0 : index
    %c0_17 = arith.constant 0 : index
    %20 = vector.load %arg5[%c0_16, %c0_17] : memref<16x778xf32, #tpu.memory_space<vmem>>, vector<16x778xf32>
    %cst_18 = arith.constant dense<0.000000e+00> : vector<16x778xf32>
    %21 = tpu.matmul %19, %20, %cst_18 {dimension_numbers = #tpu.dot_dimension_numbers<[1], [0], [0], [1], [0, 0, 1, 1], [], []>} : vector<16x16xf32>, vector<16x778xf32>, vector<16x778xf32> -> vector<16x778xf32>
    %22 = vector.extract_strided_slice %21 {offsets = [0, 0], sizes = [1, 778], strides = [1, 1]} : vector<16x778xf32> to vector<1x778xf32>
    %23 = arith.mulf %22, %7 : vector<1x778xf32>
    %24 = vector.extract_strided_slice %21 {offsets = [1, 0], sizes = [1, 778], strides = [1, 1]} : vector<16x778xf32> to vector<1x778xf32>
    %25 = arith.mulf %24, %12 : vector<1x778xf32>
    %26 = arith.addf %23, %25 : vector<1x778xf32>
    %27 = vector.extract_strided_slice %21 {offsets = [2, 0], sizes = [1, 778], strides = [1, 1]} : vector<16x778xf32> to vector<1x778xf32>
    %28 = arith.mulf %27, %17 : vector<1x778xf32>
    %29 = arith.addf %26, %28 : vector<1x778xf32>
    %30 = vector.extract_strided_slice %21 {offsets = [3, 0], sizes = [1, 778], strides = [1, 1]} : vector<16x778xf32> to vector<1x778xf32>
    %31 = arith.addf %29, %30 : vector<1x778xf32>
    %32 = vector.extract_strided_slice %21 {offsets = [4, 0], sizes = [1, 778], strides = [1, 1]} : vector<16x778xf32> to vector<1x778xf32>
    %33 = arith.mulf %32, %7 : vector<1x778xf32>
    %34 = vector.extract_strided_slice %21 {offsets = [5, 0], sizes = [1, 778], strides = [1, 1]} : vector<16x778xf32> to vector<1x778xf32>
    %35 = arith.mulf %34, %12 : vector<1x778xf32>
    %36 = arith.addf %33, %35 : vector<1x778xf32>
    %37 = vector.extract_strided_slice %21 {offsets = [6, 0], sizes = [1, 778], strides = [1, 1]} : vector<16x778xf32> to vector<1x778xf32>
    %38 = arith.mulf %37, %17 : vector<1x778xf32>
    %39 = arith.addf %36, %38 : vector<1x778xf32>
    %40 = vector.extract_strided_slice %21 {offsets = [7, 0], sizes = [1, 778], strides = [1, 1]} : vector<16x778xf32> to vector<1x778xf32>
    %41 = arith.addf %39, %40 : vector<1x778xf32>
    %42 = vector.extract_strided_slice %21 {offsets = [8, 0], sizes = [1, 778], strides = [1, 1]} : vector<16x778xf32> to vector<1x778xf32>
    %43 = arith.mulf %42, %7 : vector<1x778xf32>
    %44 = vector.extract_strided_slice %21 {offsets = [9, 0], sizes = [1, 778], strides = [1, 1]} : vector<16x778xf32> to vector<1x778xf32>
    %45 = arith.mulf %44, %12 : vector<1x778xf32>
    %46 = arith.addf %43, %45 : vector<1x778xf32>
    %47 = vector.extract_strided_slice %21 {offsets = [10, 0], sizes = [1, 778], strides = [1, 1]} : vector<16x778xf32> to vector<1x778xf32>
    %48 = arith.mulf %47, %17 : vector<1x778xf32>
    %49 = arith.addf %46, %48 : vector<1x778xf32>
    %50 = vector.extract_strided_slice %21 {offsets = [11, 0], sizes = [1, 778], strides = [1, 1]} : vector<16x778xf32> to vector<1x778xf32>
    %51 = arith.addf %49, %50 : vector<1x778xf32>
    %52 = tpu.concatenate %31, %41, %51 in 0 : vector<1x778xf32>, vector<1x778xf32>, vector<1x778xf32> -> vector<3x778xf32>
    %c0_19 = arith.constant 0 : index
    %c0_20 = arith.constant 0 : index
    %c0_21 = arith.constant 0 : index
    %53 = vector.load %arg7[%c0_19, %c0_20, %c0_21] : memref<1x3x778xf32, #tpu.memory_space<vmem>>, vector<1x3x778xf32>
    %54 = vector.shape_cast %53 : vector<1x3x778xf32> to vector<3x778xf32>
    %55 = vector.shape_cast %52 : vector<3x778xf32> to vector<1x3x778xf32>
    tpu.vector_store %arg7[%c0_19, %c0_20, %c0_21], %55 {strides = array<i32>} : memref<1x3x778xf32, #tpu.memory_space<vmem>>, vector<1x3x778xf32>,
    %c0_22 = arith.constant 0 : index
    %c0_23 = arith.constant 0 : index
    %56 = vector.load %arg6[%c0_22, %c0_23] : memref<778x16xf32, #tpu.memory_space<vmem>>, vector<778x16xf32>
    %cst_24 = arith.constant dense<0.000000e+00> : vector<3x16xf32>
    %57 = tpu.matmul %52, %56, %cst_24 {dimension_numbers = #tpu.dot_dimension_numbers<[1], [0], [0], [1], [0, 0, 1, 1], [], []>} : vector<3x778xf32>, vector<778x16xf32>, vector<3x16xf32> -> vector<3x16xf32>
    %c0_25 = arith.constant 0 : index
    %c0_26 = arith.constant 0 : index
    %c0_27 = arith.constant 0 : index
    %58 = vector.load %arg8[%c0_25, %c0_26, %c0_27] : memref<1x3x16xf32, #tpu.memory_space<vmem>>, vector<1x3x16xf32>
    %59 = vector.shape_cast %58 : vector<1x3x16xf32> to vector<3x16xf32>
    %60 = vector.shape_cast %57 : vector<3x16xf32> to vector<1x3x16xf32>
    tpu.vector_store %arg8[%c0_25, %c0_26, %c0_27], %60 {strides = array<i32>} : memref<1x3x16xf32, #tpu.memory_space<vmem>>, vector<1x3x16xf32>,
    return
  }
  func.func @transform_0(%arg0: i32) -> (i32, i32, i32) {
    %c0_i32 = arith.constant 0 : i32
    %c0_i32_0 = arith.constant 0 : i32
    %c0_i32_1 = arith.constant 0 : i32
    return %arg0, %c0_i32, %c0_i32_0 : i32, i32, i32
  }
  func.func @transform_1(%arg0: i32) -> (i32, i32, i32) {
    %c0_i32 = arith.constant 0 : i32
    %c0_i32_0 = arith.constant 0 : i32
    %c0_i32_1 = arith.constant 0 : i32
    return %arg0, %c0_i32, %c0_i32_0 : i32, i32, i32
  }
  func.func @transform_2(%arg0: i32) -> (i32, i32) {
    %c0_i32 = arith.constant 0 : i32
    %c0_i32_0 = arith.constant 0 : i32
    %c0_i32_1 = arith.constant 0 : i32
    return %c0_i32, %c0_i32_0 : i32, i32
  }
  func.func @transform_3(%arg0: i32) -> (i32, i32, i32) {
    %c0_i32 = arith.constant 0 : i32
    %c0_i32_0 = arith.constant 0 : i32
    %c0_i32_1 = arith.constant 0 : i32
    %c0_i32_2 = arith.constant 0 : i32
    return %c0_i32, %c0_i32_0, %c0_i32_1 : i32, i32, i32
  }
  func.func @transform_4(%arg0: i32) -> (i32, i32) {
    %c0_i32 = arith.constant 0 : i32
    %c0_i32_0 = arith.constant 0 : i32
    %c0_i32_1 = arith.constant 0 : i32
    return %c0_i32, %c0_i32_0 : i32, i32
  }
  func.func @transform_5(%arg0: i32) -> (i32, i32) {
    %c0_i32 = arith.constant 0 : i32
    %c0_i32_0 = arith.constant 0 : i32
    %c0_i32_1 = arith.constant 0 : i32
    return %c0_i32, %c0_i32_0 : i32, i32
  }
  func.func @transform_6(%arg0: i32) -> (i32, i32, i32) {
    %c0_i32 = arith.constant 0 : i32
    %c0_i32_0 = arith.constant 0 : i32
    %c0_i32_1 = arith.constant 0 : i32
    return %arg0, %c0_i32, %c0_i32_0 : i32, i32, i32
  }
  func.func @transform_7(%arg0: i32) -> (i32, i32, i32) {
    %c0_i32 = arith.constant 0 : i32
    %c0_i32_0 = arith.constant 0 : i32
    %c0_i32_1 = arith.constant 0 : i32
    return %arg0, %c0_i32, %c0_i32_0 : i32, i32, i32
  }
}

</mosaic_0001>

<bundles_post_ra>
// kernel: mano_forward.1
= control target key start
LH: loop header
LB: loop body
LE: loop exit
PB: predicated region body
PF: predicated region fallthrough
CT: control target
= control target key end

     0   :  { %s3948_s24 = smov 0   ;;  %s5941_s0 = inlined_call_operand.vmem [shape: f32[2,1,145], index: 0, kind: input, shape index: {}]   ;;  %s5942_s1 = inlined_call_operand.vmem [shape: f32[2,16,16], index: 1, kind: input, shape index: {}]   ;;  %s5943_s2 = inlined_call_operand.vmem [shape: f32[3,778], index: 2, kind: input, shape index: {}]   ;;  %s5944_s3 = inlined_call_operand.vmem [shape: f32[3,145,778], index: 3, kind: input, shape index: {}]   ;;  %s5945_s4 = inlined_call_operand.vmem [shape: f32[16,778], index: 4, kind: input, shape index: {}]   ;;  %s5946_s5 = inlined_call_operand.vmem [shape: f32[778,16], index: 5, kind: input, shape index: {}]   ;;  %s5947_s6 = inlined_call_operand.vmem [shape: f32[2,3,778], index: 6, kind: output, shape index: {0}]   ;;  %s5948_s7 = inlined_call_operand.vmem [shape: f32[2,3,16], index: 7, kind: output, shape index: {1}]  }
   0x1 LB: > { %s2914_s25 = sadd.s32 4294967295, %s3902_s24   ;;  %p2918_p0 = scmp.ge.s32.totalorder %s3902_s24, 1  ;;  %s3902_s24 = sphi %s3948_s24, %s18_s24  }
   0x2   : > { %p249_p1 = scmp.lt.s32.totalorder %s3902_s24, 3 }
   0x4   : > { %p250_p2 = pnand %p2918_p0, %p249_p1 }
   0x5   : > { %v315_v0 = vld [vmem:[%s5944_s3 + $0x18] sm:$0xff] (!%p250_p2)  ;;  %v322_v1 = vld [vmem:[%s5944_s3 + $0x50] sm:$0xff] (!%p250_p2)  ;;  %v321_v4 = vld [vmem:[%s5944_s3 + $0x48] sm:$0xff] (!%p250_p2)  ;;  %p4018_p3 = scmp.lt.s32.totalorder (!%p250_p2), %s2914_s25, 1  ;;  %v446_v39 = vlaneseq (!%p250_p2)  ;;  %vm455_vm0 = vcmask (!%p250_p2), 138240   ;;  %vm458_vm1 = vcmask (!%p250_p2), 1040384  }
   0x6   : > { %253 = sbr.rel (%p250_p2) target bundleno = 736 (0x2e0), region = 44  ;;  %v314_v2 = vld [vmem:[%s5944_s3 + $0x10] sm:$0xff] (!%p250_p2)  ;;  %v3398_v3 = vpack.c.bf16 (!%p250_p2), %v322_v1, %v315_v0  ;;  %v329_v5 = vld [vmem:[%s5944_s3 + $0x88] sm:$0xff] (!%p250_p2)  ;;  %v336_v6 = vld [vmem:[%s5944_s3 + $0xc0] sm:$0xff] (!%p250_p2)  ;;  %vm1715_vm2 = vcmask (!%p250_p2), 130048   ;;  %vm2404_vm3 = vcmask (!%p250_p2), 1041408  }
   0x7   : > { %v3400_v7 = vpack.c.bf16 (!%p250_p2), %v321_v4, %v314_v2  ;;  %v3402_v8 = vpack.c.bf16 (!%p250_p2), %v336_v6, %v329_v5  ;;  %v328_v9 = vld [vmem:[%s5944_s3 + $0x80] sm:$0xff] (!%p250_p2)  ;;  %v335_v10 = vld [vmem:[%s5944_s3 + $0xb8] sm:$0xff] (!%p250_p2)  ;;  %v350_v12 = vld [vmem:[%s5944_s3 + $0x130] sm:$0xff] (!%p250_p2)  ;;  %v4082_v55 = vshrl.u32 (!%p250_p2), %v446_v39, 7  ;;  %vm3906_vm4 = vmmov (!%p250_p2), 1  }
   0x8   : > { %v343_v11 = vld [vmem:[%s5944_s3 + $0xf8] sm:$0xff] (!%p250_p2)  ;;  %3399 = vmatprep.subr.bf16.mxu1 (!%p250_p2), %v3398_v3  ;;  %v3404_v13 = vpack.c.bf16 (!%p250_p2), %v335_v10, %v328_v9  ;;  %v342_v14 = vld [vmem:[%s5944_s3 + $0xf0] sm:$0xff] (!%p250_p2)  ;;  %v313_v15 = vld [vmem:[%s5944_s3 + $0x8] sm:$0xff] (!%p250_p2)  ;;  %vm3907_vm6 = vmmov (!%p250_p2), 0   ;;  %vm2428_vm7 = vcmask (!%p250_p2), 75776   ;;  %vm2528_vm8 = vcmask (!%p250_p2), 80896  }
   0x9   : > { %3401 = vmatpush1.bf16.msra.mxu1 (!%p250_p2), %v3400_v7  ;;  %v3406_v16 = vpack.c.bf16 (!%p250_p2), %v350_v12, %v343_v11  ;;  %v349_v17 = vld [vmem:[%s5944_s3 + $0x128] sm:$0xff] (!%p250_p2)  ;;  %v320_v19 = vld [vmem:[%s5944_s3 + $0x40] sm:$0xff] (!%p250_p2)  ;;  %v319_v23 = vld [vmem:[%s5944_s3 + $0x38] sm:$0xff] (!%p250_p2)  ;;  %v4113_v4 = vsub.s32 (!%p250_p2), 1, %v4082_v55  ;;  %vm2814_vm9 = vcmask (!%p250_p2), 124928  }
   0xa   : > { %3403 = vmatprep.subr.bf16.mxu1 (!%p250_p2), %v3402_v8  ;;  %v357_v18 = vld [vmem:[%s5944_s3 + $0x168] sm:$0xff] (!%p250_p2)  ;;  %v364_v20 = vld [vmem:[%s5944_s3 + $0x1a0] sm:$0xff] (!%p250_p2)  ;;  %v3362_v21 = vpack.c.bf16 (!%p250_p2), %v320_v19, %v313_v15  ;;  %v327_v25 = vld [vmem:[%s5944_s3 + $0x78] sm:$0xff] (!%p250_p2)  ;;  %v3408_v27 = vpack.c.bf16 (!%p250_p2), %v349_v17, %v342_v14 }
   0xb   : > { %v312_v22 = vld [vmem:[%s5944_s3] sm:$0xff] (!%p250_p2)  ;;  %v334_v26 = vld [vmem:[%s5944_s3 + $0xb0] sm:$0xff] (!%p250_p2)  ;;  %v3410_v31 = vpack.c.bf16 (!%p250_p2), %v364_v20, %v357_v18  ;;  %v363_v32 = vld [vmem:[%s5944_s3 + $0x198] sm:$0xff] (!%p250_p2) }
   0xc   : > { %v3364_v24 = vpack.c.bf16 (!%p250_p2), %v319_v23, %v312_v22  ;;  %3363 = vmatprep.subr.bf16.mxu0 (!%p250_p2), %v3362_v21  ;;  %v356_v28 = vld [vmem:[%s5944_s3 + $0x160] sm:$0xff] (!%p250_p2)  ;;  %v3366_v29 = vpack.c.bf16 (!%p250_p2), %v334_v26, %v327_v25  ;;  %v326_v30 = vld [vmem:[%s5944_s3 + $0x70] sm:$0xff] (!%p250_p2)  ;;  %v371_v33 = vld [vmem:[%s5944_s3 + $0x1d8] sm:$0xff] (!%p250_p2) }
   0xd   : > { %3405 = vmatpush1.bf16.msra.mxu1 %v3404_v13  ;;  %v333_v34 = vld [vmem:[%s5944_s3 + $0xa8] sm:$0xff]  ;;  %v378_v35 = vld [vmem:[%s5944_s3 + $0x210] sm:$0xff]  ;;  %v348_v38 = vld [vmem:[%s5944_s3 + $0x120] sm:$0xff]  ;;  %s5963_s25 = smov (!%p4018_p3, %s2914_s25), 1  ;;  %v3412_v43 = vpack.c.bf16 %v363_v32, %v356_v28 }
   0xe   : > { %3407 = vmatprep.subr.bf16.mxu1 %v3406_v16  ;;  %3365 = vmatpush1.bf16.msra.mxu0 %v3364_v24  ;;  %v3368_v36 = vpack.c.bf16 %v333_v34, %v326_v30  ;;  %v341_v37 = vld [vmem:[%s5944_s3 + $0xe8] sm:$0xff]  ;;  %v340_v41 = vld [vmem:[%s5944_s3 + $0xe0] sm:$0xff]  ;;  %v347_v42 = vld [vmem:[%s5944_s3 + $0x118] sm:$0xff]  ;;  %v3414_v46 = vpack.c.bf16 %v378_v35, %v371_v33  ;;  %s2919_s21 = sshll.u32 %s5963_s25, 1  ;;  %s3235_s8 = sshll.u32 %s5963_s25, 4 }
   0xf   : > { %3367 = vmatprep.subr.bf16.mxu0 %v3366_v29  ;;  %v3370_v40 = vpack.c.bf16 %v348_v38, %v341_v37  ;;  %v370_v44 = vld [vmem:[%s5944_s3 + $0x1d0] sm:$0xff]  ;;  %v355_v45 = vld [vmem:[%s5944_s3 + $0x158] sm:$0xff]  ;;  %v377_v47 = vld [vmem:[%s5944_s3 + $0x208] sm:$0xff]  ;;  %v3372_v49 = vpack.c.bf16 %v347_v42, %v340_v41  ;;  %s292_s15 = scalar_lea.vmem %s5941_s0, %s2919_s21  ;;  %s297_s19 = scalar_lea.vmem %s5942_s1, %s3235_s8 }
  0x10   : > { %v385_v48 = vld [vmem:[%s5944_s3 + $0x248] sm:$0xff]  ;;  %v362_v50 = vld [vmem:[%s5944_s3 + $0x190] sm:$0xff]  ;;  %v392_v51 = vld [vmem:[%s5944_s3 + $0x280] sm:$0xff]  ;;  %v3416_v58 = vpack.c.bf16 %v377_v47, %v370_v44  ;;  %v4195_v44 = vsub.s32 0, %v4082_v55  ;;  %s3883_s26 = smul.u32 28, %s5963_s25  ;;  %s2923_s17 = sshll.u32 %s5963_s25, 2 }
  0x11   : > { %3409 = vmatpush1.bf16.msra.mxu1 %v3408_v27  ;;  %v3374_v52 = vpack.c.bf16 %v362_v50, %v355_v45  ;;  %v354_v53 = vld [vmem:[%s5944_s3 + $0x150] sm:$0xff]  ;;  %v361_v54 = vld [vmem:[%s5944_s3 + $0x188] sm:$0xff]  ;;  %v376_v57 = vld [vmem:[%s5944_s3 + $0x200] sm:$0xff]  ;;  %v3418_v59 = vpack.c.bf16 %v392_v51, %v385_v48  ;;  %s306_s20 = scalar_lea.vmem %s5948_s7, %s2923_s17 }
  0x12   : > { %3411 = vmatprep.subr.bf16.mxu1 %v3410_v31  ;;  %3369 = vmatpush1.bf16.msra.mxu0 %v3368_v36  ;;  %v369_v56 = vld [vmem:[%s5944_s3 + $0x1c8] sm:$0xff]  ;;  %v384_v60 = vld [vmem:[%s5944_s3 + $0x240] sm:$0xff]  ;;  %v391_v61 = vld [vmem:[%s5944_s3 + $0x278] sm:$0xff]  ;;  %v3376_v63 = vpack.c.bf16 %v361_v54, %v354_v53  ;;  %s5807_s29 = scalar_lea.vmem %s5947_s6, %s3883_s26 }
  0x13   : > { %3371 = vmatprep.subr.bf16.mxu0 %v3370_v40  ;;  %v399_v62 = vld [vmem:[%s5944_s3 + $0x2b8] sm:$0xff]  ;;  %v406_v0 = vld [vmem:[%s5944_s3 + $0x2f0] sm:$0xff]  ;;  %v3378_v1 = vpack.c.bf16 %v376_v57, %v369_v56  ;;  %v368_v2 = vld [vmem:[%s5944_s3 + $0x1c0] sm:$0xff]  ;;  %v3420_v7 = vpack.c.bf16 %v391_v61, %v384_v60 }
  0x14   : > { %v375_v3 = vld [vmem:[%s5944_s3 + $0x1f8] sm:$0xff]  ;;  %v390_v6 = vld [vmem:[%s5944_s3 + $0x270] sm:$0xff]  ;;  %v3422_v9 = vpack.c.bf16 %v406_v0, %v399_v62  ;;  %v405_v10 = vld [vmem:[%s5944_s3 + $0x2e8] sm:$0xff]  ;;  %v3904_v62 = vmov 0.0|0.0  }
  0x15   : > { %3413 = vmatpush1.bf16.msra.mxu1 %v3412_v43  ;;  %v383_v5 = vld [vmem:[%s5944_s3 + $0x238] sm:$0xff]  ;;  %v398_v8 = vld [vmem:[%s5944_s3 + $0x2b0] sm:$0xff]  ;;  %v413_v11 = vld [vmem:[%s5944_s3 + $0x328] sm:$0xff]  ;;  %v3380_v12 = vpack.c.bf16 %v375_v3, %v368_v2 }
  0x16   : > { %3415 = vmatprep.subr.bf16.mxu1 %v3414_v46  ;;  %3373 = vmatpush1.bf16.msra.mxu0 %v3372_v49  ;;  %v307_v13 = vld [vmem:[%s292_s15] sm:$0x3]  ;;  %v3382_v15 = vpack.c.bf16 %v390_v6, %v383_v5  ;;  %v382_v16 = vld [vmem:[%s5944_s3 + $0x230] sm:$0xff]  ;;  %v389_v17 = vld [vmem:[%s5944_s3 + $0x268] sm:$0xff]  ;;  %v3424_v21 = vpack.c.bf16 %v405_v10, %v398_v8 }
  0x17   : > { %3375 = vmatprep.subr.bf16.mxu0 %v3374_v52  ;;  %v420_v14 = vld [vmem:[%s5944_s3 + $0x360] sm:$0xff]  ;;  %v4140_v18 = vrot.slane %v307_v13, %v4113_v4  ;;  %v397_v19 = vld [vmem:[%s5944_s3 + $0x2a8] sm:$0xff]  ;;  %v419_v24 = vld [vmem:[%s5944_s3 + $0x358] sm:$0xff]  ;;  %v3384_v26 = vpack.c.bf16 %v389_v17, %v382_v16  ;;  %v4217_v53 = vrot.slane %v307_v13, %v4195_v44 }
  0x18   : > { %v404_v20 = vld [vmem:[%s5944_s3 + $0x2e0] sm:$0xff]  ;;  %v3426_v22 = vpack.c.bf16 %v420_v14, %v413_v11  ;;  %v427_v25 = vld [vmem:[%s5944_s3 + $0x398] sm:$0xff]  ;;  %v434_v27 = vld [vmem:[%s5944_s3 + $0x3d0] sm:$0xff] }
  0x19   : > { %3417 = vmatpush1.bf16.msra.mxu1 %v3416_v58  ;;  %2929 = vmatprep.mubr.msk.f32.mxu1 %vm455_vm0, %v4140_v18  ;;  %v412_v23 = vld [vmem:[%s5944_s3 + $0x320] sm:$0xff]  ;;  %v3386_v28 = vpack.c.bf16 %v404_v20, %v397_v19  ;;  %v403_v30 = vld [vmem:[%s5944_s3 + $0x2d8] sm:$0xff]  ;;  %v418_v32 = vld [vmem:[%s5944_s3 + $0x350] sm:$0xff]  ;;  %v3430_v34 = vpack.c.bf16 %v434_v27, %v427_v25 }
  0x1a   : > { %3419 = vmatprep.subr.bf16.mxu1 %v3418_v59  ;;  %3377 = vmatpush1.bf16.msra.mxu0 %v3376_v63  ;;  %v396_v29 = vld [vmem:[%s5944_s3 + $0x2a0] sm:$0xff]  ;;  %v411_v31 = vld [vmem:[%s5944_s3 + $0x318] sm:$0xff]  ;;  %v3428_v33 = vpack.c.bf16 %v419_v24, %v412_v23  ;;  %v426_v35 = vld [vmem:[%s5944_s3 + $0x390] sm:$0xff] }
  0x1b   : > { %3379 = vmatprep.subr.bf16.mxu0 %v3378_v1  ;;  %2926 = vmatprep.mubr.msk.f32.mxu0 %vm455_vm0, %v4140_v18  ;;  %v433_v36 = vld [vmem:[%s5944_s3 + $0x3c8] sm:$0xff]  ;;  %v3388_v37 = vpack.c.bf16 %v403_v30, %v396_v29  ;;  %v3390_v38 = vpack.c.bf16 %v418_v32, %v411_v31  ;;  %v410_v39 = vld [vmem:[%s5944_s3 + $0x310] sm:$0xff]  ;;  %v432_v42 = vld [vmem:[%s5944_s3 + $0x3c0] sm:$0xff] }
  0x1c   : > { %v417_v40 = vld [vmem:[%s5944_s3 + $0x348] sm:$0xff]  ;;  %v3432_v43 = vpack.c.bf16 %v433_v36, %v426_v35  ;;  %v318_v47 = vld [vmem:[%s5944_s3 + $0x30] sm:$0xff]  ;;  %v424_v50 = vld [vmem:[%s5944_s3 + $0x380] sm:$0xff] }
  0x1d   : > { %3421 = vmatpush1.bf16.msra.mxu1 %v3420_v7  ;;  %v425_v41 = vld [vmem:[%s5944_s3 + $0x388] sm:$0xff]  ;;  %v3392_v45 = vpack.c.bf16 %v417_v40, %v410_v39  ;;  %v431_v51 = vld [vmem:[%s5944_s3 + $0x3b8] sm:$0xff]  ;;  %v440_v52 = vld [vmem:[%s5944_s3 + $0x400] sm:$0x1] }
  0x1e   : > { %3423 = vmatprep.subr.bf16.mxu1 %v3422_v9  ;;  %3381 = vmatpush1.bf16.msra.mxu0 %v3380_v12  ;;  %v441_v46 = vld [vmem:[%s5944_s3 + $0x408] sm:$0x1]  ;;  %v3394_v48 = vpack.c.bf16 %v432_v42, %v425_v41  ;;  %v3396_v56 = vpack.c.bf16 %v431_v51, %v424_v50  ;;  %v332_v57 = vld [vmem:[%s5944_s3 + $0xa0] sm:$0xff]  ;;  %v339_v58 = vld [vmem:[%s5944_s3 + $0xd8] sm:$0xff] }
  0x1f   : > { %3383 = vmatprep.subr.bf16.mxu0 %v3382_v15  ;;  %v325_v49 = vld [vmem:[%s5944_s3 + $0x68] sm:$0xff]  ;;  %v439_v59 = vld [vmem:[%s5944_s3 + $0x3f8] sm:$0x1]  ;;  %v324_v61 = vld [vmem:[%s5944_s3 + $0x60] sm:$0xff]  ;;  %v3474_v0 = vpack.c.bf16 %v339_v58, %v332_v57 }
  0x20   : > { %v3471_v54 = vpack.c.bf16 %v325_v49, %v318_v47  ;;  %v317_v60 = vld [vmem:[%s5944_s3 + $0x28] sm:$0xff]  ;;  %v346_v63 = vld [vmem:[%s5944_s3 + $0x110] sm:$0xff]  ;;  %v316_v2 = vld [vmem:[%s5944_s3 + $0x20] sm:$0xff] }
  0x21   : > { %3425 = vmatpush1.bf16.msra.mxu1 %v3424_v21  ;;  %v353_v1 = vld [vmem:[%s5944_s3 + $0x148] sm:$0xff]  ;;  %v323_v3 = vld [vmem:[%s5944_s3 + $0x58] sm:$0xff]  ;;  %v438_v5 = vld [vmem:[%s5944_s3 + $0x3f0] sm:$0x1]  ;;  %v3434_v6 = vpack.c.bf16 %v324_v61, %v317_v60 }
  0x22   : > { %3427 = vmatprep.subr.bf16.mxu1 %v3426_v22  ;;  %3385 = vmatpush1.bf16.msra.mxu0 %v3384_v26  ;;  %v331_v7 = vld [vmem:[%s5944_s3 + $0x98] sm:$0xff]  ;;  %v338_v8 = vld [vmem:[%s5944_s3 + $0xd0] sm:$0xff]  ;;  %v3436_v9 = vpack.c.bf16 %v323_v3, %v316_v2  ;;  %v3477_v10 = vpack.c.bf16 %v353_v1, %v346_v63  ;;  %v360_v11 = vld [vmem:[%s5944_s3 + $0x180] sm:$0xff] }
  0x23   : > { %3387 = vmatprep.subr.bf16.mxu0 %v3386_v28  ;;  %v3438_v12 = vpack.c.bf16 %v338_v8, %v331_v7  ;;  %v330_v13 = vld [vmem:[%s5944_s3 + $0x90] sm:$0xff]  ;;  %v337_v14 = vld [vmem:[%s5944_s3 + $0xc8] sm:$0xff]  ;;  %v367_v15 = vld [vmem:[%s5944_s3 + $0x1b8] sm:$0xff] }
  0x24   : > { %v345_v16 = vld [vmem:[%s5944_s3 + $0x108] sm:$0xff]  ;;  %v352_v17 = vld [vmem:[%s5944_s3 + $0x140] sm:$0xff]  ;;  %v3440_v19 = vpack.c.bf16 %v337_v14, %v330_v13  ;;  %v3480_v20 = vpack.c.bf16 %v367_v15, %v360_v11  ;;  %v374_v21 = vld [vmem:[%s5944_s3 + $0x1f0] sm:$0xff] }
  0x25   : > { %3429 = vmatpush1.bf16.msra.mxu1 %v3428_v33  ;;  %v3442_v22 = vpack.c.bf16 %v352_v17, %v345_v16  ;;  %v344_v23 = vld [vmem:[%s5944_s3 + $0x100] sm:$0xff]  ;;  %v351_v24 = vld [vmem:[%s5944_s3 + $0x138] sm:$0xff]  ;;  %v381_v25 = vld [vmem:[%s5944_s3 + $0x228] sm:$0xff] }
  0x26   : > { %3431 = vmatprep.subr.bf16.mxu1 %v3430_v34  ;;  %3389 = vmatpush1.bf16.msra.mxu0 %v3388_v37  ;;  %v359_v26 = vld [vmem:[%s5944_s3 + $0x178] sm:$0xff]  ;;  %v366_v27 = vld [vmem:[%s5944_s3 + $0x1b0] sm:$0xff]  ;;  %v3444_v28 = vpack.c.bf16 %v351_v24, %v344_v23  ;;  %v3483_v29 = vpack.c.bf16 %v381_v25, %v374_v21  ;;  %v388_v30 = vld [vmem:[%s5944_s3 + $0x260] sm:$0xff]  ;;  %v5949_v23 = vmov 0.0  }
  0x27   : > { %3391 = vmatprep.subr.bf16.mxu0 %v3390_v38  ;;  %v3446_v31 = vpack.c.bf16 %v366_v27, %v359_v26  ;;  %v358_v32 = vld [vmem:[%s5944_s3 + $0x170] sm:$0xff]  ;;  %v365_v33 = vld [vmem:[%s5944_s3 + $0x1a8] sm:$0xff]  ;;  %v395_v34 = vld [vmem:[%s5944_s3 + $0x298] sm:$0xff] }
  0x28   : > { %v373_v35 = vld [vmem:[%s5944_s3 + $0x1e8] sm:$0xff]  ;;  %v380_v36 = vld [vmem:[%s5944_s3 + $0x220] sm:$0xff]  ;;  %v3448_v37 = vpack.c.bf16 %v365_v33, %v358_v32  ;;  %v3486_v38 = vpack.c.bf16 %v395_v34, %v388_v30  ;;  %v402_v39 = vld [vmem:[%s5944_s3 + $0x2d0] sm:$0xff] }
  0x29   : > { %3433 = vmatpush1.bf16.msra.mxu1 %v3432_v43  ;;  %v3450_v40 = vpack.c.bf16 %v380_v36, %v373_v35  ;;  %v372_v41 = vld [vmem:[%s5944_s3 + $0x1e0] sm:$0xff]  ;;  %v379_v42 = vld [vmem:[%s5944_s3 + $0x218] sm:$0xff]  ;;  %v409_v43 = vld [vmem:[%s5944_s3 + $0x308] sm:$0xff] }
  0x2a   : > { %2927 = vmatprep.subr.msk.mxu1 %vm458_vm1, %v441_v46  ;;  %3393 = vmatpush1.bf16.msra.mxu0 %v3392_v45  ;;  %v387_v45 = vld [vmem:[%s5944_s3 + $0x258] sm:$0xff]  ;;  %v394_v46 = vld [vmem:[%s5944_s3 + $0x290] sm:$0xff]  ;;  %v3452_v47 = vpack.c.bf16 %v379_v42, %v372_v41  ;;  %v416_v49 = vld [vmem:[%s5944_s3 + $0x340] sm:$0xff] }
  0x2b   : > { %3395 = vmatprep.subr.bf16.mxu0 %v3394_v48  ;;  %v3489_v48 = vpack.c.bf16 %v409_v43, %v402_v39  ;;  %v3454_v50 = vpack.c.bf16 %v394_v46, %v387_v45  ;;  %v386_v51 = vld [vmem:[%s5944_s3 + $0x250] sm:$0xff]  ;;  %v408_v57 = vld [vmem:[%s5944_s3 + $0x300] sm:$0xff]  ;;  %v437_v1 = vld [vmem:[%s5944_s3 + $0x3e8] sm:$0xff] }
  0x2c   : > { %v430_v60 = vld [vmem:[%s5944_s3 + $0x3b0] sm:$0xff]  ;;  %v400_v63 = vld [vmem:[%s5944_s3 + $0x2c0] sm:$0xff]  ;;  %v415_v2 = vld [vmem:[%s5944_s3 + $0x338] sm:$0xff] }
  0x2d   : > { %2928 = vmatpush1.msk.msra.mxu1 %vm458_vm1, %v440_v52  ;;  %v393_v52 = vld [vmem:[%s5944_s3 + $0x288] sm:$0xff]  ;;  %v422_v3 = vld [vmem:[%s5944_s3 + $0x370] sm:$0xff]  ;;  %v436_v11 = vld [vmem:[%s5944_s3 + $0x3e0] sm:$0xff] }
  0x2e   : > { %616 = vmatmul.mubr.f32.vlgmr.msra.gmra.mrb[0].mxu1 %v4217_v53  ;;  %3470 = vmatprep.subr.bf16.mxu1 %v3904_v62  ;;  %v3456_v58 = vpack.c.bf16 %v393_v52, %v386_v51  ;;  %v3462_v7 = vpack.c.bf16 %v422_v3, %v415_v2  ;;  %v414_v8 = vld [vmem:[%s5944_s3 + $0x330] sm:$0xff]  ;;  %v2945_v13 = vld [vmem:[%s5944_s3 + $0x478] sm:$0xff]  ;;  %v428_v21 = vld [vmem:[%s5944_s3 + $0x3a0] sm:$0xff] }
  0x2f   : > { %3472 = vmatpush1.bf16.msra.mxu1 %v3471_v54  ;;  %3397 = vmatpush1.bf16.msra.mxu0 %v3396_v56  ;;  %v423_v54 = vld [vmem:[%s5944_s3 + $0x378] sm:$0xff]  ;;  %v401_v56 = vld [vmem:[%s5944_s3 + $0x2c8] sm:$0xff]  ;;  %v2944_v15 = vld [vmem:[%s5944_s3 + $0x470] sm:$0xff] }
  0x30   : > { %3473 = vmatprep.subr.bf16.mxu1 %v3904_v62  ;;  %2924 = vmatprep.subr.msk.mxu0 %vm458_vm1, %v439_v59  ;;  %v3492_v59 = vpack.c.bf16 %v423_v54, %v416_v49  ;;  %v3458_v61 = vpack.c.bf16 %v408_v57, %v401_v56  ;;  %v2937_v14 = vld [vmem:[%s5944_s3 + $0x438] sm:$0xff]  ;;  %v2952_v17 = vld [vmem:[%s5944_s3 + $0x4b0] sm:$0xff]  ;;  %v444_v24 = vld [vmem:[%s5944_s3 + $0x420] sm:$0x1] }
  0x31   : > { %2934 = vmatprep.mubr.msk.f32.mxu1 %vm455_vm0, %v4140_v18  ;;  %v3535_v26 = vpack.c.bf16 %v2944_v15, %v2937_v14  ;;  %v2973_v32 = vld [vmem:[%s5944_s3 + $0x558] sm:$0xff]  ;;  %v2936_v34 = vld [vmem:[%s5944_s3 + $0x430] sm:$0xff]  ;;  %v2943_v35 = vld [vmem:[%s5944_s3 + $0x468] sm:$0xff] }
  0x32   : > { %v443_v33 = vld [vmem:[%s5944_s3 + $0x418] sm:$0x1]  ;;  %v2942_v39 = vld [vmem:[%s5944_s3 + $0x460] sm:$0xff]  ;;  %v2972_v41 = vld [vmem:[%s5944_s3 + $0x550] sm:$0xff] }
  0x33   : > { %3475 = vmatpush1.bf16.msra.mxu1 %v3474_v0  ;;  %2925 = vmatpush1.msk.msra.mxu0 %vm458_vm1, %v438_v5  ;;  %v407_v0 = vld [vmem:[%s5944_s3 + $0x2f8] sm:$0xff]  ;;  %v2950_v42 = vld [vmem:[%s5944_s3 + $0x4a0] sm:$0xff]  ;;  %v442_v45 = vld [vmem:[%s5944_s3 + $0x410] sm:$0x1] }
  0x34   : > { %3476 = vmatprep.subr.bf16.mxu1 %v3904_v62  ;;  %3435 = vmatprep.subr.bf16.mxu0 %v3434_v6  ;;  %v3460_v5 = vpack.c.bf16 %v407_v0, %v400_v63  ;;  %v3495_v6 = vpack.c.bf16 %v437_v1, %v430_v60  ;;  %v2957_v43 = vld [vmem:[%s5944_s3 + $0x4d8] sm:$0xff]  ;;  %v2980_v46 = vld [vmem:[%s5944_s3 + $0x590] sm:$0xff]  ;;  %v2979_v51 = vld [vmem:[%s5944_s3 + $0x588] sm:$0xff] }
  0x35   : > { %545 = vmatmul.mubr.f32.vlgmr.msra.gmra.mrb[0].mxu0 %v4217_v53  ;;  %v3501_v52 = vpack.c.bf16 %v2957_v43, %v2950_v42  ;;  %v2949_v54 = vld [vmem:[%s5944_s3 + $0x498] sm:$0xff]  ;;  %v2956_v56 = vld [vmem:[%s5944_s3 + $0x4d0] sm:$0xff]  ;;  %v2971_v60 = vld [vmem:[%s5944_s3 + $0x548] sm:$0xff] }
  0x36   : > { %3437 = vmatpush1.bf16.msra.mxu0 %v3436_v9  ;;  %2932 = vmatprep.mubr.msk.f32.mxu0 %vm455_vm0, %v4140_v18  ;;  %v421_v9 = vld [vmem:[%s5944_s3 + $0x368] sm:$0xff]  ;;  %v3001_v63 = vld [vmem:[%s5944_s3 + $0x638] sm:$0xff]  ;;  %v3503_v0 = vpack.c.bf16 %v2956_v56, %v2949_v54  ;;  %vm5863_vm5 = vmpackc.low %vm2404_vm3, %vm3906_vm4 }
  0x37   : > { %3478 = vmatpush1.bf16.msra.mxu1 %v3477_v10  ;;  %3439 = vmatprep.subr.bf16.mxu0 %v3438_v12  ;;  %v429_v10 = vld [vmem:[%s5944_s3 + $0x3a8] sm:$0xff]  ;;  %v2938_v12 = vld [vmem:[%s5944_s3 + $0x440] sm:$0xff]  ;;  %v3464_v16 = vpack.c.bf16 %v421_v9, %v414_v8  ;;  %v2993_v2 = vld [vmem:[%s5944_s3 + $0x5f8] sm:$0xff] }
  0x38   : > { %3479 = vmatprep.subr.bf16.mxu1 %v3904_v62  ;;  %v3533_v25 = vpack.c.bf16 %v2945_v13, %v2938_v12  ;;  %v3000_v8 = vld [vmem:[%s5944_s3 + $0x630] sm:$0xff]  ;;  %v2978_v9 = vld [vmem:[%s5944_s3 + $0x580] sm:$0xff]  ;;  %v3015_v12 = vld [vmem:[%s5944_s3 + $0x6a8] sm:$0xff] }
  0x39   : > { %v3551_v14 = vpack.c.bf16 %v3000_v8, %v2993_v2  ;;  %v3007_v15 = vld [vmem:[%s5944_s3 + $0x668] sm:$0xff]  ;;  %v3005_v43 = vld [vmem:[%s5944_s3 + $0x658] sm:$0xff] }
  0x3a   : > { %3441 = vmatpush1.bf16.msra.mxu0 %v3440_v19  ;;  %v2959_v19 = vld [vmem:[%s5944_s3 + $0x4e8] sm:$0xff]  ;;  %v3049_v56 = vld [vmem:[%s5944_s3 + $0x7b8] sm:$0xff] }
  0x3b   : > { %3481 = vmatpush1.bf16.msra.mxu1 %v3480_v20  ;;  %3443 = vmatprep.subr.bf16.mxu0 %v3442_v22  ;;  %v3466_v20 = vpack.c.bf16 %v436_v11, %v429_v10  ;;  %v435_v22 = vld [vmem:[%s5944_s3 + $0x3d8] sm:$0xff]  ;;  %v3537_v27 = vpack.c.bf16 %v2959_v19, %v2952_v17  ;;  %v3008_v11 = vld [vmem:[%s5944_s3 + $0x670] sm:$0xff]  ;;  %v3055_v8 = vld [vmem:[%s5944_s3 + $0x7e8] sm:$0xff] }
  0x3c   : > { %3482 = vmatprep.subr.bf16.mxu1 %v3904_v62  ;;  %v3468_v30 = vpack.c.bf16 %v435_v22, %v428_v21  ;;  %v2985_v10 = vld [vmem:[%s5944_s3 + $0x5b8] sm:$0xff]  ;;  %v2984_v19 = vld [vmem:[%s5944_s3 + $0x5b0] sm:$0xff]  ;;  %v3014_v21 = vld [vmem:[%s5944_s3 + $0x6a0] sm:$0xff] }
  0x3d   : > { %v2977_v17 = vld [vmem:[%s5944_s3 + $0x578] sm:$0xff]  ;;  %v2992_v22 = vld [vmem:[%s5944_s3 + $0x5f0] sm:$0xff] }
  0x3e   : > { %3445 = vmatpush1.bf16.msra.mxu0 %v3444_v28  ;;  %v2951_v28 = vld [vmem:[%s5944_s3 + $0x4a8] sm:$0xff] }
  0x3f   : > { %3484 = vmatpush1.bf16.msra.mxu1 %v3483_v29  ;;  %3447 = vmatprep.subr.bf16.mxu0 %v3446_v31  ;;  %v2958_v29 = vld [vmem:[%s5944_s3 + $0x4e0] sm:$0xff] }
  0x40   : > { %3485 = vmatprep.subr.bf16.mxu1 %v3904_v62  ;;  %v2966_v31 = vld [vmem:[%s5944_s3 + $0x520] sm:$0xff]  ;;  %v3539_v36 = vpack.c.bf16 %v2958_v29, %v2951_v28  ;;  %v3555_v28 = vpack.c.bf16 %v3014_v21, %v3007_v15  ;;  %v3021_v29 = vld [vmem:[%s5944_s3 + $0x6d8] sm:$0xff] }
  0x41   : > { %v3054_v15 = vld [vmem:[%s5944_s3 + $0x7e0] sm:$0xff] }
  0x42   : > { %3449 = vmatpush1.bf16.msra.mxu0 %v3448_v37  ;;  %v2965_v37 = vld [vmem:[%s5944_s3 + $0x518] sm:$0xff] }
  0x43   : > { %3487 = vmatpush1.bf16.msra.mxu1 %v3486_v38  ;;  %3451 = vmatprep.subr.bf16.mxu0 %v3450_v40  ;;  %v2935_v38 = vld [vmem:[%s5944_s3 + $0x428] sm:$0xff]  ;;  %v3541_v40 = vpack.c.bf16 %v2973_v32, %v2966_v31  ;;  %v2998_v32 = vld [vmem:[%s5944_s3 + $0x620] sm:$0xff] }
  0x44   : > { %3488 = vmatprep.subr.bf16.mxu1 %v3904_v62  ;;  %v3499_v49 = vpack.c.bf16 %v2942_v39, %v2935_v38  ;;  %v2991_v31 = vld [vmem:[%s5944_s3 + $0x5e8] sm:$0xff] }
  0x45   : > { %v3043_v38 = vld [vmem:[%s5944_s3 + $0x788] sm:$0xff]  ;;  %v3515_v39 = vpack.c.bf16 %v2998_v32, %v2991_v31  ;;  %v2954_v31 = vld [vmem:[%s5944_s3 + $0x4c0] sm:$0xff]  ;;  %v2961_v32 = vld [vmem:[%s5944_s3 + $0x4f8] sm:$0xff] }
  0x46   : > { %3453 = vmatpush1.bf16.msra.mxu0 %v3452_v47  ;;  %v2987_v47 = vld [vmem:[%s5944_s3 + $0x5c8] sm:$0xff] }
  0x47   : > { %3490 = vmatpush1.bf16.msra.mxu1 %v3489_v48  ;;  %3455 = vmatprep.subr.bf16.mxu0 %v3454_v50  ;;  %v3497_v48 = vpack.c.bf16 %v2943_v35, %v2936_v34  ;;  %v3543_v50 = vpack.c.bf16 %v2972_v41, %v2965_v37  ;;  %v3545_v57 = vpack.c.bf16 %v2987_v47, %v2980_v46  ;;  %v3028_v34 = vld [vmem:[%s5944_s3 + $0x710] sm:$0xff]  ;;  %v3006_v35 = vld [vmem:[%s5944_s3 + $0x660] sm:$0xff]  ;;  %v3035_v41 = vld [vmem:[%s5944_s3 + $0x748] sm:$0xff] }
  0x48   : > { %3491 = vmatprep.subr.bf16.mxu1 %v3904_v62  ;;  %v3036_v37 = vld [vmem:[%s5944_s3 + $0x750] sm:$0xff]  ;;  %v3042_v47 = vld [vmem:[%s5944_s3 + $0x780] sm:$0xff] }
  0x49   : > { %v3561_v46 = vpack.c.bf16 %v3043_v38, %v3036_v37  ;;  %v3563_v54 = vpack.c.bf16 %v3042_v47, %v3035_v41  ;;  %v2983_v37 = vld [vmem:[%s5944_s3 + $0x5a8] sm:$0xff]  ;;  %v3573_v38 = vpack.c.bf16 %v2961_v32, %v2954_v31  ;;  %v2990_v41 = vld [vmem:[%s5944_s3 + $0x5e0] sm:$0xff]  ;;  %v2997_v47 = vld [vmem:[%s5944_s3 + $0x618] sm:$0xff] }
  0x4a   : > { %3457 = vmatpush1.bf16.msra.mxu0 %v3456_v58  ;;  %v2986_v58 = vld [vmem:[%s5944_s3 + $0x5c0] sm:$0xff]  ;;  %v3045_v31 = vld [vmem:[%s5944_s3 + $0x798] sm:$0xff] }
  0x4b   : > { %3493 = vmatpush1.bf16.msra.mxu1 %v3492_v59  ;;  %3459 = vmatprep.subr.bf16.mxu0 %v3458_v61  ;;  %v2964_v59 = vld [vmem:[%s5944_s3 + $0x510] sm:$0xff]  ;;  %v2994_v61 = vld [vmem:[%s5944_s3 + $0x600] sm:$0xff]  ;;  %v3547_v1 = vpack.c.bf16 %v2986_v58, %v2979_v51  ;;  %v3057_v51 = vld [vmem:[%s5944_s3 + $0x7f8] sm:$0xff] }
  0x4c   : > { %3494 = vmatprep.subr.bf16.mxu1 %v3904_v62  ;;  %v3505_v3 = vpack.c.bf16 %v2971_v60, %v2964_v59  ;;  %v3019_v58 = vld [vmem:[%s5944_s3 + $0x6c8] sm:$0xff]  ;;  %v3026_v59 = vld [vmem:[%s5944_s3 + $0x700] sm:$0xff] }
  0x4e   : > { %3461 = vmatpush1.bf16.msra.mxu0 %v3460_v5  ;;  %v2963_v5 = vld [vmem:[%s5944_s3 + $0x508] sm:$0xff] }
  0x4f   : > { %3496 = vmatpush1.bf16.msra.mxu1 %v3495_v6  ;;  %3463 = vmatprep.subr.bf16.mxu0 %v3462_v7  ;;  %v2970_v6 = vld [vmem:[%s5944_s3 + $0x540] sm:$0xff]  ;;  %v3549_v7 = vpack.c.bf16 %v3001_v63, %v2994_v61  ;;  %v3056_v61 = vld [vmem:[%s5944_s3 + $0x7f0] sm:$0xff] }
  0x50   : > { %729 = vmatprep.subr.mxu1 %v5949_v23  ;;  %v3507_v13 = vpack.c.bf16 %v2970_v6, %v2963_v5  ;;  %v3034_v63 = vld [vmem:[%s5944_s3 + $0x740] sm:$0xff]  ;;  %v3567_v2 = vpack.c.bf16 %v3056_v61, %v3049_v56  ;;  %v3033_v5 = vld [vmem:[%s5944_s3 + $0x738] sm:$0xff]  ;;  %v3040_v6 = vld [vmem:[%s5944_s3 + $0x770] sm:$0xff] }
  0x51   : > { %v2988_v61 = vld [vmem:[%s5944_s3 + $0x5d0] sm:$0xff] }
  0x52   : > { %3465 = vmatpush1.bf16.msra.mxu0 %v3464_v16  ;;  %v3509_v16 = vpack.c.bf16 %v2985_v10, %v2978_v9  ;;  %v3064_v9 = vld [vmem:[%s5944_s3 + $0x830] sm:$0x1]  ;;  %v2941_v10 = vld [vmem:[%s5944_s3 + $0x458] sm:$0xff] }
  0x53   : > { %2933 = vmatpush1.msk.msra.mxu1 %vm458_vm1, %v444_v24  ;;  %3467 = vmatprep.subr.bf16.mxu0 %v3466_v20  ;;  %v3553_v20 = vpack.c.bf16 %v3015_v12, %v3008_v11  ;;  %v2999_v24 = vld [vmem:[%s5944_s3 + $0x628] sm:$0xff]  ;;  %v2948_v11 = vld [vmem:[%s5944_s3 + $0x490] sm:$0xff]  ;;  %v3527_v12 = vpack.c.bf16 %v3040_v6, %v3033_v5  ;;  %v3025_v5 = vld [vmem:[%s5944_s3 + $0x6f8] sm:$0xff] }
  0x54   : > { %758 = vmatmul.mubr.f32.vlgmr.msra.gmra.mrb[2].mxu1 %v4217_v53  ;;  %3534 = vmatprep.subr.bf16.mxu1 %v3533_v25  ;;  %v3022_v25 = vld [vmem:[%s5944_s3 + $0x6e0] sm:$0xff] }
  0x55   : > { %3536 = vmatpush1.bf16.msra.mxu1 %v3535_v26  ;;  %3073 = vmatprep.mubr.msk.f32.mxu1 %vm455_vm0, %v4140_v18  ;;  %v3029_v26 = vld [vmem:[%s5944_s3 + $0x718] sm:$0xff] }
  0x56   : > { %3538 = vmatprep.subr.bf16.mxu1 %v3537_v27  ;;  %3469 = vmatpush1.bf16.msra.mxu0 %v3468_v30  ;;  %v3511_v27 = vpack.c.bf16 %v2984_v19, %v2977_v17  ;;  %v3513_v30 = vpack.c.bf16 %v2999_v24, %v2992_v22  ;;  %v3606_v17 = vpack.c.bf16 %v2948_v11, %v2941_v10  ;;  %v2955_v19 = vld [vmem:[%s5944_s3 + $0x4c8] sm:$0xff]  ;;  %v3062_v22 = vld [vmem:[%s5944_s3 + $0x820] sm:$0x1]  ;;  %v2940_v24 = vld [vmem:[%s5944_s3 + $0x450] sm:$0xff] }
  0x57   : > { %2930 = vmatprep.subr.msk.mxu0 %vm458_vm1, %v443_v33  ;;  %v3557_v33 = vpack.c.bf16 %v3029_v26, %v3022_v25  ;;  %v2947_v25 = vld [vmem:[%s5944_s3 + $0x488] sm:$0xff]  ;;  %v3010_v10 = vld [vmem:[%s5944_s3 + $0x680] sm:$0xff]  ;;  %v3017_v11 = vld [vmem:[%s5944_s3 + $0x6b8] sm:$0xff] }
  0x59   : > { %3540 = vmatpush1.bf16.msra.mxu1 %v3539_v36  ;;  %v3013_v36 = vld [vmem:[%s5944_s3 + $0x698] sm:$0xff] }
  0x5a   : > { %3542 = vmatprep.subr.bf16.mxu1 %v3541_v40  ;;  %2931 = vmatpush1.msk.msra.mxu0 %vm458_vm1, %v442_v45  ;;  %v3559_v40 = vpack.c.bf16 %v3028_v34, %v3021_v29  ;;  %v3517_v42 = vpack.c.bf16 %v3013_v36, %v3006_v35  ;;  %v3012_v45 = vld [vmem:[%s5944_s3 + $0x690] sm:$0xff]  ;;  %v2946_v29 = vld [vmem:[%s5944_s3 + $0x480] sm:$0xff]  ;;  %v3569_v34 = vpack.c.bf16 %v2947_v25, %v2940_v24  ;;  %v3053_v25 = vld [vmem:[%s5944_s3 + $0x7d8] sm:$0xff] }
  0x5b   : > { %3498 = vmatprep.subr.bf16.mxu0 %v3497_v48  ;;  %687 = vmatmul.mubr.f32.vlgmr.msra.gmra.mrb[2].mxu0 %v4217_v53  ;;  %v3020_v48 = vld [vmem:[%s5944_s3 + $0x6d0] sm:$0xff] }
  0x5c   : > { %3500 = vmatpush1.bf16.msra.mxu0 %v3499_v49  ;;  %3070 = vmatprep.mubr.msk.f32.mxu0 %vm455_vm0, %v4140_v18  ;;  %v3027_v49 = vld [vmem:[%s5944_s3 + $0x708] sm:$0xff] }
  0x5d   : > { %3544 = vmatpush1.bf16.msra.mxu1 %v3543_v50  ;;  %3502 = vmatprep.subr.bf16.mxu0 %v3501_v52  ;;  %v3050_v50 = vld [vmem:[%s5944_s3 + $0x7c0] sm:$0xff]  ;;  %v3519_v52 = vpack.c.bf16 %v3012_v45, %v3005_v43  ;;  %v2975_v43 = vld [vmem:[%s5944_s3 + $0x568] sm:$0xff] }
  0x5e   : > { %3546 = vmatprep.subr.bf16.mxu1 %v3545_v57  ;;  %v3521_v57 = vpack.c.bf16 %v3027_v49, %v3020_v48  ;;  %v3565_v60 = vpack.c.bf16 %v3057_v51, %v3050_v50  ;;  %v2967_v49 = vld [vmem:[%s5944_s3 + $0x528] sm:$0xff]  ;;  %v2974_v50 = vld [vmem:[%s5944_s3 + $0x560] sm:$0xff]  ;;  %v3004_v51 = vld [vmem:[%s5944_s3 + $0x650] sm:$0xff] }
  0x5f   : > { %v3579_v56 = vpack.c.bf16 %v2974_v50, %v2967_v49  ;;  %v3058_v49 = vld [vmem:[%s5944_s3 + $0x800] sm:$0xff]  ;;  %v3067_v50 = vld [vmem:[%s5944_s3 + $0x848] sm:$0x1] }
  0x60   : > { %3504 = vmatpush1.bf16.msra.mxu0 %v3503_v0  ;;  %v3041_v0 = vld [vmem:[%s5944_s3 + $0x778] sm:$0xff] }
  0x61   : > { %3548 = vmatpush1.bf16.msra.mxu1 %v3547_v1  ;;  %3506 = vmatprep.subr.bf16.mxu0 %v3505_v3  ;;  %v3523_v1 = vpack.c.bf16 %v3026_v59, %v3019_v58  ;;  %v3525_v3 = vpack.c.bf16 %v3041_v0, %v3034_v63  ;;  %v3011_v58 = vld [vmem:[%s5944_s3 + $0x688] sm:$0xff]  ;;  %v3018_v63 = vld [vmem:[%s5944_s3 + $0x6c0] sm:$0xff]  ;;  %v2996_v0 = vld [vmem:[%s5944_s3 + $0x610] sm:$0xff] }
  0x62   : > { %3550 = vmatprep.subr.bf16.mxu1 %v3549_v7  ;;  %v3048_v7 = vld [vmem:[%s5944_s3 + $0x7b0] sm:$0xff] }
  0x64   : > { %3508 = vmatpush1.bf16.msra.mxu0 %v3507_v13  ;;  %v3529_v13 = vpack.c.bf16 %v3055_v8, %v3048_v7  ;;  %v2995_v7 = vld [vmem:[%s5944_s3 + $0x608] sm:$0xff]  ;;  %v3002_v8 = vld [vmem:[%s5944_s3 + $0x640] sm:$0xff] }
  0x65   : > { %3552 = vmatpush1.bf16.msra.mxu1 %v3551_v14  ;;  %3510 = vmatprep.subr.bf16.mxu0 %v3509_v16  ;;  %v3047_v14 = vld [vmem:[%s5944_s3 + $0x7a8] sm:$0xff] }
  0x66   : > { %3554 = vmatprep.subr.bf16.mxu1 %v3553_v20  ;;  %v3063_v16 = vld [vmem:[%s5944_s3 + $0x828] sm:$0x1]  ;;  %v2962_v20 = vld [vmem:[%s5944_s3 + $0x500] sm:$0xff]  ;;  %v3531_v21 = vpack.c.bf16 %v3054_v15, %v3047_v14  ;;  %v3589_v15 = vpack.c.bf16 %v3017_v11, %v3010_v10  ;;  %v3065_v10 = vld [vmem:[%s5944_s3 + $0x838] sm:$0x1] }
  0x67   : > { %v3609_v26 = vpack.c.bf16 %v2962_v20, %v2955_v19  ;;  %v3039_v14 = vld [vmem:[%s5944_s3 + $0x768] sm:$0xff]  ;;  %v3046_v19 = vld [vmem:[%s5944_s3 + $0x7a0] sm:$0xff]  ;;  %v3024_v20 = vld [vmem:[%s5944_s3 + $0x6f0] sm:$0xff] }
  0x68   : > { %3512 = vmatpush1.bf16.msra.mxu0 %v3511_v27  ;;  %v2969_v27 = vld [vmem:[%s5944_s3 + $0x538] sm:$0xff]  ;;  %v3627_v24 = vpack.c.bf16 %v3046_v19, %v3039_v14  ;;  %v3093_v19 = vld [vmem:[%s5944_s3 + $0x8c0] sm:$0xff] }
  0x69   : > { %3556 = vmatpush1.bf16.msra.mxu1 %v3555_v28  ;;  %3514 = vmatprep.subr.bf16.mxu0 %v3513_v30  ;;  %v2939_v28 = vld [vmem:[%s5944_s3 + $0x448] sm:$0xff]  ;;  %v2976_v30 = vld [vmem:[%s5944_s3 + $0x570] sm:$0xff]  ;;  %v3124_v11 = vld [vmem:[%s5944_s3 + $0x9b8] sm:$0xff] }
  0x6a   : > { %3558 = vmatprep.subr.bf16.mxu1 %v3557_v33  ;;  %v3061_v33 = vld [vmem:[%s5944_s3 + $0x818] sm:$0x1]  ;;  %v3571_v35 = vpack.c.bf16 %v2946_v29, %v2939_v28  ;;  %v3612_v36 = vpack.c.bf16 %v2976_v30, %v2969_v27  ;;  %v3023_v27 = vld [vmem:[%s5944_s3 + $0x6e8] sm:$0xff]  ;;  %v3030_v28 = vld [vmem:[%s5944_s3 + $0x720] sm:$0xff] }
  0x6b   : > { %v3060_v29 = vld [vmem:[%s5944_s3 + $0x810] sm:$0xff]  ;;  %v3038_v30 = vld [vmem:[%s5944_s3 + $0x760] sm:$0xff]  ;;  %v3595_v32 = vpack.c.bf16 %v3030_v28, %v3023_v27 }
  0x6c   : > { %3516 = vmatpush1.bf16.msra.mxu0 %v3515_v39  ;;  %v2953_v39 = vld [vmem:[%s5944_s3 + $0x4b8] sm:$0xff]  ;;  %v3145_v27 = vld [vmem:[%s5944_s3 + $0xa60] sm:$0xff] }
  0x6d   : > { %3560 = vmatpush1.bf16.msra.mxu1 %v3559_v40  ;;  %3518 = vmatprep.subr.bf16.mxu0 %v3517_v42  ;;  %v2960_v40 = vld [vmem:[%s5944_s3 + $0x4f0] sm:$0xff] }
  0x6e   : > { %3562 = vmatprep.subr.bf16.mxu1 %v3561_v46  ;;  %v2968_v42 = vld [vmem:[%s5944_s3 + $0x530] sm:$0xff]  ;;  %v3575_v45 = vpack.c.bf16 %v2960_v40, %v2953_v39  ;;  %v3615_v46 = vpack.c.bf16 %v2990_v41, %v2983_v37  ;;  %v3082_v39 = vld [vmem:[%s5944_s3 + $0x868] sm:$0xff]  ;;  %v3089_v40 = vld [vmem:[%s5944_s3 + $0x8a0] sm:$0xff] }
  0x6f   : > { %v3577_v48 = vpack.c.bf16 %v2975_v43, %v2968_v42  ;;  %v3052_v37 = vld [vmem:[%s5944_s3 + $0x7d0] sm:$0xff]  ;;  %v3081_v41 = vld [vmem:[%s5944_s3 + $0x860] sm:$0xff]  ;;  %v3088_v42 = vld [vmem:[%s5944_s3 + $0x898] sm:$0xff] }
  0x70   : > { %3520 = vmatpush1.bf16.msra.mxu0 %v3519_v52  ;;  %v2982_v52 = vld [vmem:[%s5944_s3 + $0x5a0] sm:$0xff] }
  0x71   : > { %3564 = vmatpush1.bf16.msra.mxu1 %v3563_v54  ;;  %3522 = vmatprep.subr.bf16.mxu0 %v3521_v57  ;;  %v2989_v54 = vld [vmem:[%s5944_s3 + $0x5d8] sm:$0xff]  ;;  %v3618_v57 = vpack.c.bf16 %v3004_v51, %v2997_v47  ;;  %v3668_v51 = vpack.c.bf16 %v3089_v40, %v3082_v39  ;;  %v3159_v39 = vld [vmem:[%s5944_s3 + $0xad0] sm:$0xff] }
  0x72   : > { %3566 = vmatprep.subr.bf16.mxu1 %v3565_v60  ;;  %v3581_v59 = vpack.c.bf16 %v2989_v54, %v2982_v52  ;;  %v2981_v60 = vld [vmem:[%s5944_s3 + $0x598] sm:$0xff]  ;;  %v3670_v52 = vpack.c.bf16 %v3088_v42, %v3081_v41  ;;  %v3151_v42 = vld [vmem:[%s5944_s3 + $0xa90] sm:$0xff] }
  0x74   : > { %3524 = vmatpush1.bf16.msra.mxu0 %v3523_v1  ;;  %v3003_v1 = vld [vmem:[%s5944_s3 + $0x648] sm:$0xff] }
  0x75   : > { %3568 = vmatpush1.bf16.msra.mxu1 %v3567_v2  ;;  %3526 = vmatprep.subr.bf16.mxu0 %v3525_v3  ;;  %v3583_v2 = vpack.c.bf16 %v2988_v61, %v2981_v60  ;;  %v3621_v3 = vpack.c.bf16 %v3018_v63, %v3011_v58  ;;  %v3585_v6 = vpack.c.bf16 %v3003_v1, %v2996_v0  ;;  %v3117_v60 = vld [vmem:[%s5944_s3 + $0x980] sm:$0xff]  ;;  %v3080_v63 = vld [vmem:[%s5944_s3 + $0x858] sm:$0xff]  ;;  %v3087_v0 = vld [vmem:[%s5944_s3 + $0x890] sm:$0xff] }
  0x76   : > { %3071 = vmatprep.subr.msk.mxu1 %vm458_vm1, %v3064_v9  ;;  %v3032_v9 = vld [vmem:[%s5944_s3 + $0x730] sm:$0xff]  ;;  %v3066_v61 = vld [vmem:[%s5944_s3 + $0x840] sm:$0x1] }
  0x78   : > { %3528 = vmatpush1.bf16.msra.mxu0 %v3527_v12  ;;  %v3587_v12 = vpack.c.bf16 %v3002_v8, %v2995_v7  ;;  %v3116_v7 = vld [vmem:[%s5944_s3 + $0x978] sm:$0xff]  ;;  %v3094_v8 = vld [vmem:[%s5944_s3 + $0x8c8] sm:$0xff] }
  0x79   : > { %3072 = vmatpush1.msk.msra.mxu1 %vm458_vm1, %v3063_v16  ;;  %3530 = vmatprep.subr.bf16.mxu0 %v3529_v13  ;;  %v3624_v13 = vpack.c.bf16 %v3032_v9, %v3025_v5  ;;  %v3009_v16 = vld [vmem:[%s5944_s3 + $0x678] sm:$0xff]  ;;  %v3086_v5 = vld [vmem:[%s5944_s3 + $0x888] sm:$0xff]  ;;  %v3101_v9 = vld [vmem:[%s5944_s3 + $0x900] sm:$0xff] }
  0x7a   : > { %1070 = vmatmul.mubr.f32.vlgmr.msra.gmra.mrb[4].mxu1 %v4217_v53  ;;  %3605 = vmatprep.subr.bf16.mxu1 %v3904_v62 }
  0x7b   : > { %3607 = vmatpush1.bf16.msra.mxu1 %v3606_v17  ;;  %3078 = vmatprep.mubr.msk.f32.mxu1 %vm455_vm0, %v4140_v18  ;;  %v3016_v17 = vld [vmem:[%s5944_s3 + $0x6b0] sm:$0xff] }
  0x7c   : > { %3608 = vmatprep.subr.bf16.mxu1 %v3904_v62  ;;  %3532 = vmatpush1.bf16.msra.mxu0 %v3531_v21  ;;  %v3031_v21 = vld [vmem:[%s5944_s3 + $0x728] sm:$0xff] }
  0x7d   : > { %3068 = vmatprep.subr.msk.mxu0 %vm458_vm1, %v3062_v22  ;;  %v3591_v22 = vpack.c.bf16 %v3016_v17, %v3009_v16  ;;  %v3123_v16 = vld [vmem:[%s5944_s3 + $0x9b0] sm:$0xff]  ;;  %v3636_v17 = vpack.c.bf16 %v3101_v9, %v3094_v8  ;;  %v3149_v9 = vld [vmem:[%s5944_s3 + $0xa80] sm:$0xff] }
  0x7f   : > { %3610 = vmatpush1.bf16.msra.mxu1 %v3609_v26  ;;  %v3593_v26 = vpack.c.bf16 %v3031_v21, %v3024_v20  ;;  %v3100_v20 = vld [vmem:[%s5944_s3 + $0x8f8] sm:$0xff] }
  0x80   : > { %3611 = vmatprep.subr.bf16.mxu1 %v3904_v62  ;;  %3069 = vmatpush1.msk.msra.mxu0 %vm458_vm1, %v3061_v33  ;;  %v3630_v33 = vpack.c.bf16 %v3060_v29, %v3053_v25  ;;  %v3115_v25 = vld [vmem:[%s5944_s3 + $0x970] sm:$0xff]  ;;  %v3638_v28 = vpack.c.bf16 %v3100_v20, %v3093_v19  ;;  %v3193_v20 = vld [vmem:[%s5944_s3 + $0xbe0] sm:$0xff] }
  0x81   : > { %3570 = vmatprep.subr.bf16.mxu0 %v3569_v34  ;;  %999 = vmatmul.mubr.f32.vlgmr.msra.gmra.mrb[4].mxu0 %v4217_v53  ;;  %v3597_v34 = vpack.c.bf16 %v3045_v31, %v3038_v30  ;;  %v3137_v30 = vld [vmem:[%s5944_s3 + $0xa20] sm:$0xff] }
  0x82   : > { %3572 = vmatpush1.bf16.msra.mxu0 %v3571_v35  ;;  %3076 = vmatprep.mubr.msk.f32.mxu0 %vm455_vm0, %v4140_v18  ;;  %v3037_v35 = vld [vmem:[%s5944_s3 + $0x758] sm:$0xff] }
  0x83   : > { %3613 = vmatpush1.bf16.msra.mxu1 %v3612_v36  ;;  %3574 = vmatprep.subr.bf16.mxu0 %v3573_v38  ;;  %v3044_v36 = vld [vmem:[%s5944_s3 + $0x790] sm:$0xff]  ;;  %v3059_v38 = vld [vmem:[%s5944_s3 + $0x808] sm:$0xff] }
  0x84   : > { %3614 = vmatprep.subr.bf16.mxu1 %v3904_v62  ;;  %v3599_v43 = vpack.c.bf16 %v3044_v36, %v3037_v35  ;;  %v3601_v47 = vpack.c.bf16 %v3059_v38, %v3052_v37  ;;  %v3144_v35 = vld [vmem:[%s5944_s3 + $0xa58] sm:$0xff]  ;;  %v3122_v36 = vld [vmem:[%s5944_s3 + $0x9a8] sm:$0xff]  ;;  %v3129_v37 = vld [vmem:[%s5944_s3 + $0x9e0] sm:$0xff] }
  0x85   : > { %v3152_v38 = vld [vmem:[%s5944_s3 + $0xa98] sm:$0xff]  ;;  %v3686_v41 = vpack.c.bf16 %v3144_v35, %v3137_v30  ;;  %v3199_v35 = vld [vmem:[%s5944_s3 + $0xc10] sm:$0xff] }
  0x86   : > { %3576 = vmatpush1.bf16.msra.mxu0 %v3575_v45  ;;  %v3096_v45 = vld [vmem:[%s5944_s3 + $0x8d8] sm:$0xff] }
  0x87   : > { %3616 = vmatpush1.bf16.msra.mxu1 %v3615_v46  ;;  %3578 = vmatprep.subr.bf16.mxu0 %v3577_v48  ;;  %v3103_v46 = vld [vmem:[%s5944_s3 + $0x910] sm:$0xff]  ;;  %v3051_v48 = vld [vmem:[%s5944_s3 + $0x7c8] sm:$0xff] }
  0x88   : > { %3617 = vmatprep.subr.bf16.mxu1 %v3904_v62  ;;  %v3672_v54 = vpack.c.bf16 %v3103_v46, %v3096_v45  ;;  %v3603_v58 = vpack.c.bf16 %v3058_v49, %v3051_v48  ;;  %v3121_v45 = vld [vmem:[%s5944_s3 + $0x9a0] sm:$0xff]  ;;  %v3128_v46 = vld [vmem:[%s5944_s3 + $0x9d8] sm:$0xff]  ;;  %v3158_v48 = vld [vmem:[%s5944_s3 + $0xac8] sm:$0xff] }
  0x89   : > { %v3136_v49 = vld [vmem:[%s5944_s3 + $0xa18] sm:$0xff] }
  0x8a   : > { %3580 = vmatpush1.bf16.msra.mxu0 %v3579_v56  ;;  %v3095_v56 = vld [vmem:[%s5944_s3 + $0x8d0] sm:$0xff] }
  0x8b   : > { %3619 = vmatpush1.bf16.msra.mxu1 %v3618_v57  ;;  %3582 = vmatprep.subr.bf16.mxu0 %v3581_v59  ;;  %v3102_v57 = vld [vmem:[%s5944_s3 + $0x908] sm:$0xff] }
  0x8c   : > { %3620 = vmatprep.subr.bf16.mxu1 %v3904_v62  ;;  %v3110_v59 = vld [vmem:[%s5944_s3 + $0x948] sm:$0xff]  ;;  %v3674_v1 = vpack.c.bf16 %v3102_v57, %v3095_v56  ;;  %v3690_v56 = vpack.c.bf16 %v3158_v48, %v3151_v42  ;;  %v3165_v57 = vld [vmem:[%s5944_s3 + $0xb00] sm:$0xff] }
  0x8d   : > { %v3198_v42 = vld [vmem:[%s5944_s3 + $0xc08] sm:$0xff] }
  0x8e   : > { %3584 = vmatpush1.bf16.msra.mxu0 %v3583_v2  ;;  %v3109_v2 = vld [vmem:[%s5944_s3 + $0x940] sm:$0xff] }
  0x8f   : > { %3622 = vmatpush1.bf16.msra.mxu1 %v3621_v3  ;;  %3586 = vmatprep.subr.bf16.mxu0 %v3585_v6  ;;  %v3079_v3 = vld [vmem:[%s5944_s3 + $0x850] sm:$0xff]  ;;  %v3676_v6 = vpack.c.bf16 %v3117_v60, %v3110_v59  ;;  %v3142_v60 = vld [vmem:[%s5944_s3 + $0xa48] sm:$0xff] }
  0x90   : > { %3623 = vmatprep.subr.bf16.mxu1 %v3904_v62  ;;  %v3634_v14 = vpack.c.bf16 %v3086_v5, %v3079_v3  ;;  %v3135_v59 = vld [vmem:[%s5944_s3 + $0xa10] sm:$0xff] }
  0x91   : > { %v3187_v3 = vld [vmem:[%s5944_s3 + $0xbb0] sm:$0xff]  ;;  %v3650_v5 = vpack.c.bf16 %v3142_v60, %v3135_v59  ;;  %v3098_v59 = vld [vmem:[%s5944_s3 + $0x8e8] sm:$0xff]  ;;  %v3105_v60 = vld [vmem:[%s5944_s3 + $0x920] sm:$0xff] }
  0x92   : > { %3588 = vmatpush1.bf16.msra.mxu0 %v3587_v12  ;;  %v3131_v12 = vld [vmem:[%s5944_s3 + $0x9f0] sm:$0xff] }
  0x93   : > { %3625 = vmatpush1.bf16.msra.mxu1 %v3624_v13  ;;  %3590 = vmatprep.subr.bf16.mxu0 %v3589_v15  ;;  %v3632_v13 = vpack.c.bf16 %v3087_v0, %v3080_v63  ;;  %v3678_v15 = vpack.c.bf16 %v3116_v7, %v3109_v2  ;;  %v3680_v21 = vpack.c.bf16 %v3131_v12, %v3124_v11  ;;  %v3172_v63 = vld [vmem:[%s5944_s3 + $0xb38] sm:$0xff]  ;;  %v3150_v0 = vld [vmem:[%s5944_s3 + $0xa88] sm:$0xff]  ;;  %v3179_v7 = vld [vmem:[%s5944_s3 + $0xb70] sm:$0xff] }
  0x94   : > { %3626 = vmatprep.subr.bf16.mxu1 %v3904_v62  ;;  %v3180_v2 = vld [vmem:[%s5944_s3 + $0xb78] sm:$0xff]  ;;  %v3186_v12 = vld [vmem:[%s5944_s3 + $0xba8] sm:$0xff] }
  0x95   : > { %v3696_v11 = vpack.c.bf16 %v3187_v3, %v3180_v2  ;;  %v3698_v19 = vpack.c.bf16 %v3186_v12, %v3179_v7  ;;  %v3127_v2 = vld [vmem:[%s5944_s3 + $0x9d0] sm:$0xff]  ;;  %v3708_v3 = vpack.c.bf16 %v3105_v60, %v3098_v59  ;;  %v3134_v7 = vld [vmem:[%s5944_s3 + $0xa08] sm:$0xff]  ;;  %v3141_v12 = vld [vmem:[%s5944_s3 + $0xa40] sm:$0xff] }
  0x96   : > { %3592 = vmatpush1.bf16.msra.mxu0 %v3591_v22  ;;  %v3130_v22 = vld [vmem:[%s5944_s3 + $0x9e8] sm:$0xff] }
  0x97   : > { %3628 = vmatpush1.bf16.msra.mxu1 %v3627_v24  ;;  %3594 = vmatprep.subr.bf16.mxu0 %v3593_v26  ;;  %v3108_v24 = vld [vmem:[%s5944_s3 + $0x938] sm:$0xff]  ;;  %v3138_v26 = vld [vmem:[%s5944_s3 + $0xa28] sm:$0xff]  ;;  %v3682_v29 = vpack.c.bf16 %v3130_v22, %v3123_v16  ;;  %v3201_v16 = vld [vmem:[%s5944_s3 + $0xc20] sm:$0xff] }
  0x98   : > { %3629 = vmatprep.subr.bf16.mxu1 %v3904_v62  ;;  %v3640_v31 = vpack.c.bf16 %v3115_v25, %v3108_v24  ;;  %v3163_v22 = vld [vmem:[%s5944_s3 + $0xaf0] sm:$0xff]  ;;  %v3170_v24 = vld [vmem:[%s5944_s3 + $0xb28] sm:$0xff] }
  0x9a   : > { %3596 = vmatpush1.bf16.msra.mxu0 %v3595_v32  ;;  %v3107_v32 = vld [vmem:[%s5944_s3 + $0x930] sm:$0xff] }
  0x9b   : > { %3631 = vmatpush1.bf16.msra.mxu1 %v3630_v33  ;;  %3598 = vmatprep.subr.bf16.mxu0 %v3597_v34  ;;  %v3114_v33 = vld [vmem:[%s5944_s3 + $0x968] sm:$0xff]  ;;  %v3684_v34 = vpack.c.bf16 %v3145_v27, %v3138_v26  ;;  %v3200_v26 = vld [vmem:[%s5944_s3 + $0xc18] sm:$0xff] }
  0x9c   : > { %1183 = vmatprep.subr.mxu1 %v5949_v23  ;;  %v3642_v40 = vpack.c.bf16 %v3114_v33, %v3107_v32  ;;  %v3178_v27 = vld [vmem:[%s5944_s3 + $0xb68] sm:$0xff]  ;;  %v3702_v30 = vpack.c.bf16 %v3200_v26, %v3193_v20  ;;  %v3177_v32 = vld [vmem:[%s5944_s3 + $0xb60] sm:$0xff]  ;;  %v3184_v33 = vld [vmem:[%s5944_s3 + $0xb98] sm:$0xff] }
  0x9d   : > { %v3162_v26 = vld [vmem:[%s5944_s3 + $0xae8] sm:$0xff] }
  0x9e   : > { %3600 = vmatpush1.bf16.msra.mxu0 %v3599_v43  ;;  %v3644_v43 = vpack.c.bf16 %v3129_v37, %v3122_v36  ;;  %v3208_v36 = vld [vmem:[%s5944_s3 + $0xc58] sm:$0x1]  ;;  %v3085_v37 = vld [vmem:[%s5944_s3 + $0x880] sm:$0xff] }
  0x9f   : > { %3077 = vmatpush1.msk.msra.mxu1 %vm458_vm1, %v3067_v50  ;;  %3602 = vmatprep.subr.bf16.mxu0 %v3601_v47  ;;  %v3688_v47 = vpack.c.bf16 %v3159_v39, %v3152_v38  ;;  %v3143_v50 = vld [vmem:[%s5944_s3 + $0xa50] sm:$0xff]  ;;  %v3092_v38 = vld [vmem:[%s5944_s3 + $0x8b8] sm:$0xff]  ;;  %v3662_v39 = vpack.c.bf16 %v3184_v33, %v3177_v32 }
  0xa0   : > { %1212 = vmatmul.mubr.f32.vlgmr.msra.gmra.mrb[6].mxu1 %v4217_v53  ;;  %3669 = vmatprep.subr.bf16.mxu1 %v3668_v51  ;;  %v3166_v51 = vld [vmem:[%s5944_s3 + $0xb08] sm:$0xff]  ;;  %v3139_v33 = vld [vmem:[%s5944_s3 + $0xa30] sm:$0xff] }
  0xa1   : > { %3671 = vmatpush1.bf16.msra.mxu1 %v3670_v52  ;;  %3217 = vmatprep.mubr.msk.f32.mxu1 %vm455_vm0, %v4140_v18  ;;  %v3173_v52 = vld [vmem:[%s5944_s3 + $0xb40] sm:$0xff] }
  0xa2   : > { %3673 = vmatprep.subr.bf16.mxu1 %v3672_v54  ;;  %3604 = vmatpush1.bf16.msra.mxu0 %v3603_v58  ;;  %v3646_v54 = vpack.c.bf16 %v3128_v46, %v3121_v45  ;;  %v3648_v58 = vpack.c.bf16 %v3143_v50, %v3136_v49  ;;  %v3741_v45 = vpack.c.bf16 %v3092_v38, %v3085_v37  ;;  %v3099_v46 = vld [vmem:[%s5944_s3 + $0x8f0] sm:$0xff]  ;;  %v3206_v49 = vld [vmem:[%s5944_s3 + $0xc48] sm:$0x1]  ;;  %v3084_v50 = vld [vmem:[%s5944_s3 + $0x878] sm:$0xff] }
  0xa3   : > { %3074 = vmatprep.subr.msk.mxu0 %vm458_vm1, %v3066_v61  ;;  %v3692_v61 = vpack.c.bf16 %v3173_v52, %v3166_v51  ;;  %v3091_v51 = vld [vmem:[%s5944_s3 + $0x8b0] sm:$0xff]  ;;  %v3161_v37 = vld [vmem:[%s5944_s3 + $0xae0] sm:$0xff] }
  0xa5   : > { %3675 = vmatpush1.bf16.msra.mxu1 %v3674_v1  ;;  %v3157_v1 = vld [vmem:[%s5944_s3 + $0xac0] sm:$0xff] }
  0xa6   : > { %3677 = vmatprep.subr.bf16.mxu1 %v3676_v6  ;;  %3075 = vmatpush1.msk.msra.mxu0 %vm458_vm1, %v3065_v10  ;;  %v3694_v6 = vpack.c.bf16 %v3172_v63, %v3165_v57  ;;  %v3652_v8 = vpack.c.bf16 %v3157_v1, %v3150_v0  ;;  %v3156_v10 = vld [vmem:[%s5944_s3 + $0xab8] sm:$0xff]  ;;  %v3090_v57 = vld [vmem:[%s5944_s3 + $0x8a8] sm:$0xff]  ;;  %v3704_v63 = vpack.c.bf16 %v3091_v51, %v3084_v50  ;;  %v3197_v50 = vld [vmem:[%s5944_s3 + $0xc00] sm:$0xff] }
  0xa7   : > { %3633 = vmatprep.subr.bf16.mxu0 %v3632_v13  ;;  %1141 = vmatmul.mubr.f32.vlgmr.msra.gmra.mrb[6].mxu0 %v4217_v53  ;;  %v3164_v13 = vld [vmem:[%s5944_s3 + $0xaf8] sm:$0xff] }
  0xa8   : > { %3635 = vmatpush1.bf16.msra.mxu0 %v3634_v14  ;;  %3214 = vmatprep.mubr.msk.f32.mxu0 %vm455_vm0, %v4140_v18  ;;  %v3171_v14 = vld [vmem:[%s5944_s3 + $0xb30] sm:$0xff] }
  0xa9   : > { %3679 = vmatpush1.bf16.msra.mxu1 %v3678_v15  ;;  %3637 = vmatprep.subr.bf16.mxu0 %v3636_v17  ;;  %v3194_v15 = vld [vmem:[%s5944_s3 + $0xbe8] sm:$0xff]  ;;  %v3654_v17 = vpack.c.bf16 %v3156_v10, %v3149_v9  ;;  %v3119_v9 = vld [vmem:[%s5944_s3 + $0x990] sm:$0xff] }
  0xaa   : > { %3681 = vmatprep.subr.bf16.mxu1 %v3680_v21  ;;  %v3656_v21 = vpack.c.bf16 %v3171_v14, %v3164_v13  ;;  %v3700_v25 = vpack.c.bf16 %v3201_v16, %v3194_v15  ;;  %v3111_v14 = vld [vmem:[%s5944_s3 + $0x950] sm:$0xff]  ;;  %v3118_v15 = vld [vmem:[%s5944_s3 + $0x988] sm:$0xff] }
  0xab   : > { %v3126_v16 = vld [vmem:[%s5944_s3 + $0x9c8] sm:$0xff] }
  0xac   : > { %3639 = vmatpush1.bf16.msra.mxu0 %v3638_v28  ;;  %v3185_v28 = vld [vmem:[%s5944_s3 + $0xba0] sm:$0xff] }
  0xad   : > { %3683 = vmatpush1.bf16.msra.mxu1 %v3682_v29  ;;  %3641 = vmatprep.subr.bf16.mxu0 %v3640_v31  ;;  %v3658_v29 = vpack.c.bf16 %v3170_v24, %v3163_v22  ;;  %v3660_v31 = vpack.c.bf16 %v3185_v28, %v3178_v27  ;;  %v3125_v24 = vld [vmem:[%s5944_s3 + $0x9c0] sm:$0xff]  ;;  %v3140_v27 = vld [vmem:[%s5944_s3 + $0xa38] sm:$0xff]  ;;  %v3147_v28 = vld [vmem:[%s5944_s3 + $0xa70] sm:$0xff] }
  0xae   : > { %3685 = vmatprep.subr.bf16.mxu1 %v3684_v34  ;;  %v3192_v34 = vld [vmem:[%s5944_s3 + $0xbd8] sm:$0xff]  ;;  %v3720_v32 = vpack.c.bf16 %v3147_v28, %v3140_v27  ;;  %v3209_v28 = vld [vmem:[%s5944_s3 + $0xc60] sm:$0x1] }
  0xb0   : > { %3643 = vmatpush1.bf16.msra.mxu0 %v3642_v40  ;;  %v3664_v40 = vpack.c.bf16 %v3199_v35, %v3192_v34  ;;  %v3146_v34 = vld [vmem:[%s5944_s3 + $0xa68] sm:$0xff]  ;;  %v3176_v35 = vld [vmem:[%s5944_s3 + $0xb58] sm:$0xff] }
  0xb1   : > { %3687 = vmatpush1.bf16.msra.mxu1 %v3686_v41  ;;  %3645 = vmatprep.subr.bf16.mxu0 %v3644_v43  ;;  %v3191_v41 = vld [vmem:[%s5944_s3 + $0xbd0] sm:$0xff]  ;;  %v3722_v38 = vpack.c.bf16 %v3146_v34, %v3139_v33  ;;  %v1714_v33 = vld [vmem:[%s5945_s4 + $0x68] sm:$0xff] }
  0xb2   : > { %3689 = vmatprep.subr.bf16.mxu1 %v3688_v47  ;;  %v3207_v43 = vld [vmem:[%s5944_s3 + $0xc50] sm:$0x1]  ;;  %v3106_v47 = vld [vmem:[%s5944_s3 + $0x928] sm:$0xff]  ;;  %v3666_v48 = vpack.c.bf16 %v3198_v42, %v3191_v41  ;;  %v3153_v42 = vld [vmem:[%s5944_s3 + $0xaa0] sm:$0xff] }
  0xb3   : > { %v3744_v52 = vpack.c.bf16 %v3106_v47, %v3099_v46  ;;  %v3168_v46 = vld [vmem:[%s5944_s3 + $0xb18] sm:$0xff]  ;;  %v3175_v47 = vld [vmem:[%s5944_s3 + $0xb50] sm:$0xff] }
  0xb4   : > { %3647 = vmatpush1.bf16.msra.mxu0 %v3646_v54  ;;  %v3113_v54 = vld [vmem:[%s5944_s3 + $0x960] sm:$0xff]  ;;  %v3728_v51 = vpack.c.bf16 %v3175_v47, %v3168_v46  ;;  %v2431_v46 = vld [vmem:[%s5946_s5 + $0x8] sm:$0xff]  ;;  %v2448_v47 = vld [vmem:[%s5946_s5 + $0x90] sm:$0xff] }
  0xb5   : > { %3691 = vmatpush1.bf16.msra.mxu1 %v3690_v56  ;;  %3649 = vmatprep.subr.bf16.mxu0 %v3648_v58  ;;  %v3083_v56 = vld [vmem:[%s5944_s3 + $0x870] sm:$0xff]  ;;  %v3120_v58 = vld [vmem:[%s5944_s3 + $0x998] sm:$0xff] }
  0xb6   : > { %3693 = vmatprep.subr.bf16.mxu1 %v3692_v61  ;;  %v3205_v61 = vld [vmem:[%s5944_s3 + $0xc40] sm:$0x1]  ;;  %v3706_v0 = vpack.c.bf16 %v3090_v57, %v3083_v56  ;;  %v3747_v1 = vpack.c.bf16 %v3120_v58, %v3113_v54  ;;  %v3174_v54 = vld [vmem:[%s5944_s3 + $0xb48] sm:$0xff]  ;;  %v3204_v56 = vld [vmem:[%s5944_s3 + $0xc38] sm:$0xff] }
  0xb7   : > { %v3182_v57 = vld [vmem:[%s5944_s3 + $0xb88] sm:$0xff]  ;;  %v3189_v58 = vld [vmem:[%s5944_s3 + $0xbc0] sm:$0xff]  ;;  %v3765_v60 = vpack.c.bf16 %v3204_v56, %v3197_v50  ;;  %v2433_v56 = vld [vmem:[%s5946_s5 + $0x18] sm:$0xff] }
  0xb8   : > { %3651 = vmatpush1.bf16.msra.mxu0 %v3650_v5  ;;  %v3097_v5 = vld [vmem:[%s5944_s3 + $0x8e0] sm:$0xff] }
  0xb9   : > { %3695 = vmatpush1.bf16.msra.mxu1 %v3694_v6  ;;  %3653 = vmatprep.subr.bf16.mxu0 %v3652_v8  ;;  %v3104_v6 = vld [vmem:[%s5944_s3 + $0x918] sm:$0xff] }
  0xba   : > { %3697 = vmatprep.subr.bf16.mxu1 %v3696_v11  ;;  %v3112_v8 = vld [vmem:[%s5944_s3 + $0x958] sm:$0xff]  ;;  %v3710_v10 = vpack.c.bf16 %v3104_v6, %v3097_v5  ;;  %v3750_v11 = vpack.c.bf16 %v3134_v7, %v3127_v2  ;;  %v3203_v2 = vld [vmem:[%s5944_s3 + $0xc30] sm:$0xff]  ;;  %v1709_v5 = vld [vmem:[%s5945_s4 + $0x40] sm:$0xff] }
  0xbb   : > { %v3712_v13 = vpack.c.bf16 %v3119_v9, %v3112_v8  ;;  %v1701_v6 = vld [vmem:[%s5945_s4] sm:$0xff]  ;;  %v1708_v7 = vld [vmem:[%s5945_s4 + $0x38] sm:$0xff]  ;;  %v3195_v9 = vld [vmem:[%s5944_s3 + $0xbf0] sm:$0xff] }
  0xbc   : > { %3655 = vmatpush1.bf16.msra.mxu0 %v3654_v17  ;;  %v3133_v17 = vld [vmem:[%s5944_s3 + $0xa00] sm:$0xff] }
  0xbd   : > { %3699 = vmatpush1.bf16.msra.mxu1 %v3698_v19  ;;  %3657 = vmatprep.subr.bf16.mxu0 %v3656_v21  ;;  %v3714_v19 = vpack.c.bf16 %v3118_v15, %v3111_v14  ;;  %v3155_v21 = vld [vmem:[%s5944_s3 + $0xab0] sm:$0xff]  ;;  %v3716_v22 = vpack.c.bf16 %v3133_v17, %v3126_v16 }
  0xbe   : > { %3701 = vmatprep.subr.bf16.mxu1 %v3700_v25  ;;  %v3132_v25 = vld [vmem:[%s5944_s3 + $0x9f8] sm:$0xff]  ;;  %v3211_v14 = vld [vmem:[%s5944_s3 + $0xc70] sm:$0x1] }
  0xc0   : > { %3659 = vmatpush1.bf16.msra.mxu0 %v3658_v29  ;;  %v3718_v29 = vpack.c.bf16 %v3132_v25, %v3125_v24  ;;  %v3210_v24 = vld [vmem:[%s5944_s3 + $0xc68] sm:$0x1]  ;;  %v1699_v25 = vld [vmem:[%s297_s19] sm:$0xff] }
  0xc1   : > { %3703 = vmatpush1.bf16.msra.mxu1 %v3702_v30  ;;  %3661 = vmatprep.subr.bf16.mxu0 %v3660_v31  ;;  %v3756_v30 = vpack.c.bf16 %v3162_v26, %v3155_v21  ;;  %v3169_v31 = vld [vmem:[%s5944_s3 + $0xb20] sm:$0xff]  ;;  %v1706_v21 = vld [vmem:[%s5945_s4 + $0x28] sm:$0xff] }
  0xc2   : > { %3215 = vmatprep.subr.msk.mxu1 %vm458_vm1, %v3208_v36  ;;  %v3154_v36 = vld [vmem:[%s5944_s3 + $0xaa8] sm:$0xff] }
  0xc3   : > { %v3724_v41 = vpack.c.bf16 %v3161_v37, %v3154_v36 }
  0xc4   : > { %3663 = vmatpush1.bf16.msra.mxu0 %v3662_v39  ;;  %v3759_v39 = vpack.c.bf16 %v3176_v35, %v3169_v31  ;;  %v1712_v31 = vld [vmem:[%s5945_s4 + $0x58] sm:$0xff] }
  0xc5   : > { %3216 = vmatpush1.msk.msra.mxu1 %vm458_vm1, %v3207_v43  ;;  %3665 = vmatprep.subr.bf16.mxu0 %v3664_v40  ;;  %v3183_v40 = vld [vmem:[%s5944_s3 + $0xb90] sm:$0xff]  ;;  %v3160_v43 = vld [vmem:[%s5944_s3 + $0xad8] sm:$0xff] }
  0xc6   : > { %1530 = vmatmul.mubr.f32.vlgmr.msra.gmra.mrb[8].mxu1 %v4217_v53  ;;  %3740 = vmatprep.subr.bf16.mxu1 %v3904_v62 }
  0xc7   : > { %3742 = vmatpush1.bf16.msra.mxu1 %v3741_v45  ;;  %3222 = vmatprep.mubr.msk.f32.mxu1 %vm455_vm0, %v4140_v18  ;;  %v3190_v45 = vld [vmem:[%s5944_s3 + $0xbc8] sm:$0xff] }
  0xc8   : > { %3743 = vmatprep.subr.bf16.mxu1 %v3904_v62  ;;  %3667 = vmatpush1.bf16.msra.mxu0 %v3666_v48  ;;  %v3726_v48 = vpack.c.bf16 %v3160_v43, %v3153_v42  ;;  %v2447_v42 = vld [vmem:[%s5946_s5 + $0x88] sm:$0xff]  ;;  %v2430_v43 = vld [vmem:[%s5946_s5] sm:$0xff] }
  0xc9   : > { %3212 = vmatprep.subr.msk.mxu0 %vm458_vm1, %v3206_v49  ;;  %v3762_v49 = vpack.c.bf16 %v3190_v45, %v3183_v40 }
  0xcb   : > { %3745 = vmatpush1.bf16.msra.mxu1 %v3744_v52  ;;  %v3167_v52 = vld [vmem:[%s5944_s3 + $0xb10] sm:$0xff] }
  0xcc   : > { %3746 = vmatprep.subr.bf16.mxu1 %v3904_v62  ;;  %3213 = vmatpush1.msk.msra.mxu0 %vm458_vm1, %v3205_v61  ;;  %v3730_v59 = vpack.c.bf16 %v3174_v54, %v3167_v52  ;;  %v3732_v61 = vpack.c.bf16 %v3189_v58, %v3182_v57  ;;  %v2432_v54 = vld [vmem:[%s5946_s5 + $0x10] sm:$0xff]  ;;  %v2450_v57 = vld [vmem:[%s5946_s5 + $0xa0] sm:$0xff] }
  0xcd   : > { %3705 = vmatprep.subr.bf16.mxu0 %v3704_v63  ;;  %1459 = vmatmul.mubr.f32.vlgmr.msra.gmra.mrb[8].mxu0 %v4217_v53  ;;  %v3181_v63 = vld [vmem:[%s5944_s3 + $0xb80] sm:$0xff]  ;;  %v3789_v58 = vpack.c.bf16 %v2433_v56, %v2432_v54  ;;  %v2469_v54 = vld [vmem:[%s5946_s5 + $0x138] sm:$0xff] }
  0xce   : > { %3707 = vmatpush1.bf16.msra.mxu0 %v3706_v0  ;;  %3220 = vmatprep.mubr.msk.f32.mxu0 %vm455_vm0, %v4140_v18  ;;  %v3148_v18 = vld [vmem:[%s5944_s3 + $0xa78] sm:$0xff] }
  0xcf   : > { %3748 = vmatpush1.bf16.msra.mxu1 %v3747_v1  ;;  %3709 = vmatprep.subr.bf16.mxu0 %v3708_v3  ;;  %v3753_v20 = vpack.c.bf16 %v3148_v18, %v3141_v12  ;;  %v3188_v0 = vld [vmem:[%s5944_s3 + $0xbb8] sm:$0xff]  ;;  %v1702_v3 = vld [vmem:[%s5945_s4 + $0x8] sm:$0xff]  ;;  %v3769_v18 = vpack.c.bf16 %v1708_v7, %v1701_v6  ;;  %v2462_v7 = vld [vmem:[%s5946_s5 + $0x100] sm:$0xff] }
  0xd0   : > { %3749 = vmatprep.subr.bf16.mxu1 %v3904_v62  ;;  %v3196_v1 = vld [vmem:[%s5944_s3 + $0xbf8] sm:$0xff]  ;;  %v3734_v8 = vpack.c.bf16 %v3188_v0, %v3181_v63  ;;  %v3767_v15 = vpack.c.bf16 %v1709_v5, %v1702_v3  ;;  %v2478_v3 = vld [vmem:[%s5946_s5 + $0x180] sm:$0xff]  ;;  %v2479_v6 = vld [vmem:[%s5946_s5 + $0x188] sm:$0xff] }
  0xd1   : > { %v1704_v12 = vld [vmem:[%s5945_s4 + $0x18] sm:$0xff] }
  0xd2   : > { %3711 = vmatpush1.bf16.msra.mxu0 %v3710_v10  ;;  %v3736_v10 = vpack.c.bf16 %v3203_v2, %v3196_v1  ;;  %v2434_v1 = vld [vmem:[%s5946_s5 + $0x20] sm:$0xff]  ;;  %v2435_v2 = vld [vmem:[%s5946_s5 + $0x28] sm:$0xff] }
  0xd3   : > { %3751 = vmatpush1.bf16.msra.mxu1 %v3750_v11  ;;  %3713 = vmatprep.subr.bf16.mxu0 %v3712_v13  ;;  %v3202_v11 = vld [vmem:[%s5944_s3 + $0xc28] sm:$0xff]  ;;  %v1711_v13 = vld [vmem:[%s5945_s4 + $0x50] sm:$0xff]  ;;  %v3793_v5 = vpack.c.bf16 %v2435_v2, %v2434_v1 }
  0xd4   : > { %3752 = vmatprep.subr.bf16.mxu1 %v3904_v62  ;;  %v3738_v16 = vpack.c.bf16 %v3202_v11, %v3195_v9  ;;  %v3771_v17 = vpack.c.bf16 %v1711_v13, %v1704_v12  ;;  %v3815_v9 = vpack.c.bf16 %v2479_v6, %v2478_v3  ;;  %v2452_v11 = vld [vmem:[%s5946_s5 + $0xb0] sm:$0xff]  ;;  %v2453_v12 = vld [vmem:[%s5946_s5 + $0xb8] sm:$0xff]  ;;  %v2442_v3 = vld [vmem:[%s5946_s5 + $0x60] sm:$0xff] }
  0xd5   : > { %v3795_v13 = vpack.c.bf16 %v2453_v12, %v2452_v11  ;;  %v2486_v6 = vld [vmem:[%s5946_s5 + $0x1c0] sm:$0xff]  ;;  %v2471_v11 = vld [vmem:[%s5946_s5 + $0x148] sm:$0xff] }
  0xd6   : > { %3715 = vmatpush1.bf16.msra.mxu0 %v3714_v19  ;;  %v1703_v19 = vld [vmem:[%s5945_s4 + $0x10] sm:$0xff] }
  0xd7   : > { %3754 = vmatpush1.bf16.msra.mxu1 %v3753_v20  ;;  %3717 = vmatprep.subr.bf16.mxu0 %v3716_v22  ;;  %v1710_v20 = vld [vmem:[%s5945_s4 + $0x48] sm:$0xff]  ;;  %v1713_v22 = vld [vmem:[%s5945_s4 + $0x60] sm:$0xff] }
  0xd8   : > { %3755 = vmatprep.subr.bf16.mxu1 %v3904_v62  ;;  %v3773_v26 = vpack.c.bf16 %v1710_v20, %v1703_v19  ;;  %v3775_v27 = vpack.c.bf16 %v1713_v22, %v1706_v21  ;;  %v2464_v19 = vld [vmem:[%s5946_s5 + $0x110] sm:$0xff]  ;;  %v2465_v20 = vld [vmem:[%s5946_s5 + $0x118] sm:$0xff] }
  0xd9   : > { %v3821_v22 = vpack.c.bf16 %v2465_v20, %v2464_v19  ;;  %v2488_v19 = vld [vmem:[%s5946_s5 + $0x1d0] sm:$0xff] }
  0xda   : > { %3719 = vmatpush1.bf16.msra.mxu0 %v3718_v29  ;;  %v1700_v29 = vld [vmem:[%s297_s19 + $0x8] sm:$0xff] }
  0xdb   : > { %3757 = vmatpush1.bf16.msra.mxu1 %v3756_v30  ;;  %3721 = vmatprep.subr.bf16.mxu0 %v3720_v32  ;;  %v1705_v30 = vld [vmem:[%s5945_s4 + $0x20] sm:$0xff]  ;;  %v1707_v32 = vld [vmem:[%s5945_s4 + $0x30] sm:$0xff] }
  0xdc   : > { %3758 = vmatprep.subr.bf16.mxu1 %v3904_v62  ;;  %v3777_v34 = vpack.c.bf16 %v1712_v31, %v1705_v30  ;;  %v3779_v35 = vpack.c.bf16 %v1714_v33, %v1707_v32  ;;  %v2483_v31 = vld [vmem:[%s5946_s5 + $0x1a8] sm:$0xff]  ;;  %v2466_v33 = vld [vmem:[%s5946_s5 + $0x120] sm:$0xff] }
  0xde   : > { %3723 = vmatpush1.bf16.msra.mxu0 %v3722_v38 }
  0xdf   : > { %3760 = vmatpush1.bf16.msra.mxu1 %v3759_v39  ;;  %3725 = vmatprep.subr.bf16.mxu0 %v3724_v41  ;;  %v2446_v41 = vld [vmem:[%s5946_s5 + $0x80] sm:$0xff] }
  0xe0   : > { %3761 = vmatprep.subr.bf16.mxu1 %v3904_v62  ;;  %v3783_v45 = vpack.c.bf16 %v2447_v42, %v2446_v41  ;;  %v2456_v41 = vld [vmem:[%s5946_s5 + $0xd0] sm:$0xff]  ;;  %v2457_v42 = vld [vmem:[%s5946_s5 + $0xd8] sm:$0xff] }
  0xe2   : > { %3727 = vmatpush1.bf16.msra.mxu0 %v3726_v48  ;;  %v2449_v48 = vld [vmem:[%s5946_s5 + $0x98] sm:$0xff] }
  0xe3   : > { %3763 = vmatpush1.bf16.msra.mxu1 %v3762_v49  ;;  %3729 = vmatprep.subr.bf16.mxu0 %v3728_v51  ;;  %v3785_v49 = vpack.c.bf16 %v2431_v46, %v2430_v43  ;;  %v3787_v50 = vpack.c.bf16 %v2449_v48, %v2448_v47  ;;  %v3803_v43 = vpack.c.bf16 %v2457_v42, %v2456_v41  ;;  %v2441_v46 = vld [vmem:[%s5946_s5 + $0x58] sm:$0xff]  ;;  %v2484_v47 = vld [vmem:[%s5946_s5 + $0x1b0] sm:$0xff]  ;;  %v2475_v41 = vld [vmem:[%s5946_s5 + $0x168] sm:$0xff] }
  0xe4   : > { %3764 = vmatprep.subr.bf16.mxu1 %v3904_v62 }
  0xe6   : > { %3731 = vmatpush1.bf16.msra.mxu0 %v3730_v59  ;;  %v2451_v59 = vld [vmem:[%s5946_s5 + $0xa8] sm:$0xff] }
  0xe7   : > { %3766 = vmatpush1.bf16.msra.mxu1 %v3765_v60  ;;  %3733 = vmatprep.subr.bf16.mxu0 %v3732_v61  ;;  %v3791_v60 = vpack.c.bf16 %v2451_v59, %v2450_v57  ;;  %v2458_v59 = vld [vmem:[%s5946_s5 + $0xe0] sm:$0xff] }
  0xe8   : > { %1643 = vmatprep.subr.mxu1 %v5949_v23 }
  0xea   : > { %3735 = vmatpush1.bf16.msra.mxu0 %v3734_v8  ;;  %v2463_v8 = vld [vmem:[%s5946_s5 + $0x108] sm:$0xff] }
  0xeb   : > { %3221 = vmatpush1.msk.msra.mxu1 %vm458_vm1, %v3211_v14  ;;  %3737 = vmatprep.subr.bf16.mxu0 %v3736_v10  ;;  %v3817_v10 = vpack.c.bf16 %v2463_v8, %v2462_v7  ;;  %v2436_v14 = vld [vmem:[%s5946_s5 + $0x30] sm:$0xff]  ;;  %v2487_v8 = vld [vmem:[%s5946_s5 + $0x1c8] sm:$0xff] }
  0xec   : > { %1672 = vmatmul.mubr.f32.vlgmr.msra.gmra.mrb[10].mxu1 %v4217_v53  ;;  %3768 = vmatprep.subr.bf16.mxu1 %v3767_v15  ;;  %v2437_v15 = vld [vmem:[%s5946_s5 + $0x38] sm:$0xff] }
  0xed   : > { %3770 = vmatpush1.bf16.msra.mxu1 %v3769_v18  ;;  %1786 = vmatprep.mubr.f32.mxu1 %v5949_v23  ;;  %v2480_v18 = vld [vmem:[%s5946_s5 + $0x190] sm:$0xff] }
  0xee   : > { %3739 = vmatpush1.bf16.msra.mxu0 %v3738_v16  ;;  %3772 = vmatprep.subr.bf16.mxu1 %v3771_v17  ;;  %v3797_v16 = vpack.c.bf16 %v2437_v15, %v2436_v14  ;;  %v2481_v17 = vld [vmem:[%s5946_s5 + $0x198] sm:$0xff] }
  0xef   : > { %3218 = vmatprep.subr.msk.mxu0 %vm458_vm1, %v3210_v24  ;;  %v3819_v21 = vpack.c.bf16 %v2481_v17, %v2480_v18  ;;  %v2454_v24 = vld [vmem:[%s5946_s5 + $0xc0] sm:$0xff]  ;;  %v2461_v14 = vld [vmem:[%s5946_s5 + $0xf8] sm:$0xff] }
  0xf0   : > { %3223 = vmatmul.mubr.msk.f32.vlgmr.msra.gmra.mrb[12].mxu1 %vm1715_vm2, %v1699_v25  ;;  %v2445_v17 = vld [vmem:[%s5946_s5 + $0x78] sm:$0xff] }
  0xf1   : > { %1792 = vmatprep.mubr.f32.mxu1 %v5949_v23  ;;  %3774 = vmatpush1.bf16.msra.mxu1 %v3773_v26 }
  0xf2   : > { %3219 = vmatpush1.msk.msra.mxu0 %vm458_vm1, %v3209_v28  ;;  %3776 = vmatprep.subr.bf16.mxu1 %v3775_v27  ;;  %v2438_v27 = vld [vmem:[%s5946_s5 + $0x40] sm:$0xff]  ;;  %v2439_v28 = vld [vmem:[%s5946_s5 + $0x48] sm:$0xff] }
  0xf3   : > { %1601 = vmatmul.mubr.f32.vlgmr.msra.gmra.mrb[10].mxu0 %v4217_v53  ;;  %3784 = vmatprep.subr.bf16.mxu0 %v3783_v45  ;;  %v3801_v30 = vpack.c.bf16 %v2439_v28, %v2438_v27  ;;  %v2440_v45 = vld [vmem:[%s5946_s5 + $0x50] sm:$0xff] }
  0xf4   : > { %3224 = vmatmul.mubr.msk.f32.gmra.mrb[14].mxu1 %vm1715_vm2, %v1700_v29  ;;  %3786 = vmatpush3.bf16.msra.mxu0 %v3785_v49  ;;  %v3805_v48 = vpack.c.bf16 %v2441_v46, %v2440_v45  ;;  %v2485_v49 = vld [vmem:[%s5946_s5 + $0x1b8] sm:$0xff] }
  0xf5   : > { %1863 = vmatprep.mubr.f32.mxu1 %v5949_v23  ;;  %3788 = vmatprep.subr.bf16.mxu0 %v3787_v50  ;;  %v3827_v50 = vpack.c.bf16 %v2485_v49, %v2484_v47  ;;  %v2493_v45 = vld [vmem:[%s5946_s5 + $0x1f8] sm:$0xff]  ;;  %v2476_v47 = vld [vmem:[%s5946_s5 + $0x170] sm:$0xff] }
  0xf8   : > { %3225 = vmatmul.mubr.msk.f32.vlgmr.msra.gmra.mrb[16].mxu1 %vm1715_vm2, %v1699_v25  ;;  %3790 = vmatpush3.bf16.msra.mxu0 %v3789_v58 }
  0xf9   : > { %1869 = vmatprep.mubr.f32.mxu1 %v5949_v23  ;;  %3778 = vmatpush1.bf16.msra.mxu1 %v3777_v34  ;;  %v2467_v34 = vld [vmem:[%s5946_s5 + $0x128] sm:$0xff] }
  0xfa   : > { %3780 = vmatprep.subr.bf16.mxu1 %v3779_v35  ;;  %3792 = vmatprep.subr.bf16.mxu0 %v3791_v60  ;;  %v2459_v60 = vld [vmem:[%s5946_s5 + $0xe8] sm:$0xff] }
  0xfb   : > { %v3807_v2 = vpack.c.bf16 %v2459_v60, %v2458_v59 }
  0xfc   : > { %3226 = vmatmul.mubr.msk.f32.gmra.mrb[18].mxu1 %vm1715_vm2, %v1700_v29  ;;  %3794 = vmatpush3.bf16.msra.mxu0 %v3793_v5  ;;  %v2443_v5 = vld [vmem:[%s5946_s5 + $0x68] sm:$0xff] }
  0xfd   : > { %1940 = vmatprep.mubr.f32.mxu1 %v5949_v23  ;;  %3796 = vmatprep.subr.bf16.mxu0 %v3795_v13  ;;  %v3809_v7 = vpack.c.bf16 %v2443_v5, %v2442_v3  ;;  %v2460_v13 = vld [vmem:[%s5946_s5 + $0xf0] sm:$0xff] }
  0xfe   : > { %v3811_v18 = vpack.c.bf16 %v2461_v14, %v2460_v13  ;;  %v2038_v14 = vsub.s32 4, %v4082_v55 }
 0x100   : > { %3227 = vmatmul.mubr.msk.f32.vlgmr.msra.gmra.mrb[20].mxu1 %vm1715_vm2, %v1699_v25  ;;  %3798 = vmatpush3.bf16.msra.mxu0 %v3797_v16  ;;  %v2444_v16 = vld [vmem:[%s5946_s5 + $0x70] sm:$0xff] }
 0x101   : > { %v5326_v53 = vpop.f32.mrb[0].mxu1  ;;  %1946 = vmatprep.mubr.f32.mxu1 %v5949_v23  ;;  %3782 = vmatpush3.bf16.msra.mxu1 %v3779_v35  ;;  %v3825_v35 = vpack.c.bf16 %v2467_v34, %v2466_v33  ;;  %v2491_v33 = vld [vmem:[%s5946_s5 + $0x1e8] sm:$0xff] }
 0x102   : > { %v5329_v36 = vpop.f32.mrb[1].mxu1  ;;  %3816 = vmatprep.subr.bf16.mxu1 %v3815_v9  ;;  %v3831_v9 = vpack.c.bf16 %v2487_v8, %v2486_v6  ;;  %v309_v8 = vld [vmem:[%s5943_s2 + $0x8] sm:$0x77] }
 0x103   : > { %v770_v37 = vcombine.low %v5326_v53, %v5329_v36 }
 0x104   : > { %3228 = vmatmul.mubr.msk.f32.gmra.mrb[22].mxu1 %vm1715_vm2, %v1700_v29 }
 0x105   : > { %3352 = vmatprep.mubr.msk.f32.mxu1 %vm1715_vm2, %v1699_v25  ;;  %v2455_v25 = vld [vmem:[%s5946_s5 + $0xc8] sm:$0xff]  ;;  %v776_v13 = vadd.f32 %v770_v37, %v309_v8  ;;  %v5588_v37 = vld [vmem:[%s5946_s5 + $0x200] sm:$0xff] }
 0x106   : > { %v3799_v26 = vpack.c.bf16 %v2455_v25, %v2454_v24  ;;  %v2472_v24 = vld [vmem:[%s5946_s5 + $0x150] sm:$0xff]  ;;  %v2473_v25 = vld [vmem:[%s5946_s5 + $0x158] sm:$0xff] }
 0x107   : > { %v3837_v28 = vpack.c.bf16 %v2473_v25, %v2472_v24  ;;  %v5624_v24 = vsub.s32 6, %v4082_v55  ;;  %v5629_v25 = vld [vmem:[%s5946_s5 + $0x218] sm:$0xff] }
 0x108   : > { %3353 = vmatmul.mubr.msk.f32.vlgmr.msra.gmra.mrb[24].mxu1 %vm1715_vm2, %v1700_v29  ;;  %v5336_v38 = vpop.f32.mrb[0].mxu0  ;;  %v2482_v29 = vld [vmem:[%s5946_s5 + $0x1a0] sm:$0xff]  ;;  %3800 = vmatprep.subr.bf16.mxu0 %v3799_v26 }
 0x109   : > { %v5338_v39 = vpop.f32.mrb[1].mxu0  ;;  %3818 = vmatpush3.bf16.msra.mxu1 %v3817_v10  ;;  %v3823_v32 = vpack.c.bf16 %v2483_v31, %v2482_v29  ;;  %3802 = vmatpush3.bf16.msra.mxu0 %v3801_v30  ;;  %v2470_v10 = vld [vmem:[%s5946_s5 + $0x140] sm:$0xff]  ;;  %v2511_v30 = vld [vmem:[%s5946_s5 + $0x288] sm:$0xff] }
 0x10a   : > { %v769_v40 = vcombine.low %v5336_v38, %v5338_v39  ;;  %3820 = vmatprep.subr.bf16.mxu1 %v3819_v21  ;;  %3804 = vmatprep.subr.bf16.mxu0 %v3803_v43  ;;  %v3833_v12 = vpack.c.bf16 %v2471_v11, %v2470_v10  ;;  %v3813_v21 = vpack.c.bf16 %v2445_v17, %v2444_v16  ;;  %v2510_v29 = vld [vmem:[%s5946_s5 + $0x280] sm:$0xff]  ;;  %v2492_v43 = vld [vmem:[%s5946_s5 + $0x1f0] sm:$0xff]  ;;  %v311_v10 = vld [vmem:[%s5943_s2 + $0x18] sm:$0x7]  ;;  %v2084_v16 = vsub.s32 5, %v4082_v55 }
 0x10b   : > { %v3847_v31 = vpack.c.bf16 %v2511_v30, %v2510_v29  ;;  %v3843_v46 = vpack.c.bf16 %v2493_v45, %v2492_v43  ;;  %v5570_v11 = vld [vmem:[%s5943_s2 + $0x10] sm:$0x77]  ;;  %v5593_v38 = vld [vmem:[%s5946_s5 + $0x208] sm:$0xff]  ;;  %v5596_v39 = vrot.slane %v776_v13, %v4195_v44  ;;  %v5674_v43 = vld [vmem:[%s5946_s5 + $0x2b8] sm:$0xff] }
 0x10c   : > { %v5679_v45 = vld [vmem:[%s5946_s5 + $0x230] sm:$0xff] }
 0x10d   : > { %3822 = vmatpush3.bf16.msra.mxu1 %v3821_v22  ;;  %3806 = vmatpush3.bf16.msra.mxu0 %v3805_v48  ;;  %v2489_v22 = vld [vmem:[%s5946_s5 + $0x1d8] sm:$0xff] }
 0x10e   : > { %3824 = vmatprep.subr.bf16.mxu1 %v3823_v32  ;;  %3808 = vmatprep.subr.bf16.mxu0 %v3807_v2  ;;  %v3835_v27 = vpack.c.bf16 %v2489_v22, %v2488_v19  ;;  %v2490_v32 = vld [vmem:[%s5946_s5 + $0x1e0] sm:$0xff]  ;;  %v2477_v48 = vld [vmem:[%s5946_s5 + $0x178] sm:$0xff]  ;;  %v5616_v19 = vld [vmem:[%s5946_s5 + $0x210] sm:$0xff]  ;;  %v5621_v22 = vsub.s32 2, %v4082_v55 }
 0x10f   : > { %v3839_v34 = vpack.c.bf16 %v2491_v33, %v2490_v32  ;;  %v3845_v49 = vpack.c.bf16 %v2477_v48, %v2476_v47  ;;  %v5660_v32 = vld [vmem:[%s5946_s5 + $0x228] sm:$0xff] }
 0x111   : > { %3826 = vmatpush3.bf16.msra.mxu1 %v3825_v35  ;;  %3810 = vmatpush3.bf16.msra.mxu0 %v3809_v7  ;;  %v2474_v35 = vld [vmem:[%s5946_s5 + $0x160] sm:$0xff] }
 0x112   : > { %3828 = vmatprep.subr.bf16.mxu1 %v3827_v50  ;;  %3812 = vmatprep.subr.bf16.mxu0 %v3811_v18  ;;  %v3841_v42 = vpack.c.bf16 %v2475_v41, %v2474_v35 }
 0x115   : > { %3814 = vmatpush3.bf16.msra.mxu0 %v3813_v21 }
 0x116   : > { %3848 = vmatprep.subr.bf16.mxu0 %v3847_v31  ;;  %v5655_v31 = vld [vmem:[%s5946_s5 + $0x220] sm:$0xff] }
 0x127   : > { %v5360_v51 = vpop.f32.mrb[2].mxu1 }
 0x128   : > { %v761_v52 = vpop.f32.mrb[3].mxu1 }
 0x129   : > { %v2468_v52 = vld [vmem:[%s5946_s5 + $0x130] sm:$0xff] }
 0x12a   : > { %v3829_v57 = vpack.c.bf16 %v2469_v54, %v2468_v52 }
 0x12c   : > { %3830 = vmatpush3.bf16.msra.mxu1 %v3829_v57 }
 0x12d   : > { %3832 = vmatprep.subr.bf16.mxu1 %v3831_v9  ;;  %v308_v9 = vld [vmem:[%s5943_s2] sm:$0x77] }
 0x12e   : > { %v5374_v61 = vpop.f32.mrb[2].mxu0 }
 0x12f   : > { %v5376_v63 = vpop.f32.mrb[3].mxu0 }
 0x130   : > { %v771_v0 = vcombine.low %v5374_v61, %v5376_v63  ;;  %3834 = vmatpush3.bf16.msra.mxu1 %v3833_v12  ;;  %v5606_v63 = vld [vmem:[%s5946_s5 + $0x290] sm:$0xff] }
 0x131   : > { %3836 = vmatprep.subr.bf16.mxu1 %v3835_v27  ;;  %v5639_v27 = vld [vmem:[%s5946_s5 + $0x2a8] sm:$0xff] }
 0x134   : > { %3838 = vmatpush3.bf16.msra.mxu1 %v3837_v28 }
 0x135   : > { %3840 = vmatprep.subr.bf16.mxu1 %v3839_v34 }
 0x138   : > { %3842 = vmatpush3.bf16.msra.mxu1 %v3841_v42 }
 0x139   : > { %3844 = vmatprep.subr.bf16.mxu1 %v3843_v46  ;;  %v5684_v46 = vld [vmem:[%s5946_s5 + $0x238] sm:$0xff] }
 0x13c   : > { %3846 = vmatpush3.bf16.msra.mxu1 %v3845_v49 }
 0x13d   : > { %3879 = vmatprep.subr.bf16.mxu1 %v3904_v62 }
 0x14d   : > { %v5470_v56 = vpop.f32.mrb[4].mxu1 }
 0x14e   : > { %v5472_v58 = vpop.f32.mrb[5].mxu1 }
 0x14f   : > { %v1225_v1 = vcombine.low %v5470_v56, %v5472_v58  ;;  %v775_v56 = vadd.f32 %v769_v40, %v308_v9  ;;  %v5598_v40 = vrot.slane %v776_v13, %v2038_v14 }
 0x151   : > { %v1228_v62 = vrot.slane %v1225_v1, 7  ;;  %v778_v1 = vadd.f32 %v5360_v51, %v311_v10  ;;  %v5601_v51 = vrot.slane %v775_v56, %v4195_v44 }
 0x153   : > { %v1236_v18 = vadd.f32 %v1228_v62, %v309_v8  ;;  %v5642_v28 = vrot.slane %v778_v1, %v4195_v44 }
 0x154   : > { %v1000_v15 = vpop.f32.mrb[4].mxu0 }
 0x155   : > { %v1002_v20 = vpop.f32.mrb[5].mxu0  ;;  %v5650_v30 = vrot.slane %v1236_v18, %v4113_v4  ;;  %v5667_v33 = vrot.slane %v1236_v18, %v2084_v16 }
 0x156   : > { %v1224_v26 = vcombine.low %v1000_v15, %v1002_v20  ;;  %v777_v15 = vadd.f32 %v771_v0, %v5570_v11  ;;  %v5611_v0 = vld [vmem:[%s5946_s5 + $0x298] sm:$0xff]  ;;  %v5618_v20 = vrot.slane %v775_v56, %v2038_v14 }
 0x158   : > { %v1227_v12 = vrot.slane %v1224_v26, 7  ;;  %v5634_v26 = vld [vmem:[%s5946_s5 + $0x2a0] sm:$0xff]  ;;  %v5645_v55 = vrot.slane %v777_v15, %v4195_v44  ;;  %v5647_v29 = vrot.slane %v777_v15, %v2038_v14  ;;  %v5665_v44 = vld [vmem:[%s5946_s5 + $0x2b0] sm:$0xff] }
 0x15a   : > { %v1235_v17 = vadd.f32 %v1227_v12, %v308_v9 }
 0x15c   : > { %v2081_v34 = vrot.slane %v1235_v17, %v4113_v4  ;;  %v2085_v47 = vrot.slane %v1235_v17, %v2084_v16 }
 0x173   : > { %v1213_v50 = vpop.f32.mrb[6].mxu1 }
 0x174   : > { %v1215_v52 = vpop.f32.mrb[7].mxu1  ;;  %v1230_v53 = vrot.slane %v1213_v50, 7 }
 0x176   : > { %v1238_v35 = vadd.f32 %v1230_v53, %v311_v10 }
 0x17a   : > { %v1142_v54 = vpop.f32.mrb[6].mxu0 }
 0x17b   : > { %v1144_v57 = vpop.f32.mrb[7].mxu0 }
 0x17c   : > { %v1226_v59 = vcombine.low %v1142_v54, %v1144_v57  ;;  %v5692_v54 = vld [vmem:[%s5946_s5 + $0x300] sm:$0xff]  ;;  %v5697_v57 = vld [vmem:[%s5946_s5 + $0x308] sm:$0x3] }
 0x17e   : > { %v1229_v36 = vrot.slane %v1226_v59, 7 }
 0x180   : > { %v1237_v41 = vadd.f32 %v1229_v36, %v5570_v11 }
 0x182   : > { %v5715_v62 = vrot.slane %v1237_v41, %v4113_v4  ;;  %v5720_v14 = vrot.slane %v1237_v41, %v2084_v16 }
 0x199   : > { %v1531_v60 = vpop.f32.mrb[8].mxu1 }
 0x19a   : > { %v1533_v2 = vpop.f32.mrb[9].mxu1 }
 0x19b   : > { %v1685_v3 = vcombine.low %v1531_v60, %v1533_v2 }
 0x19d   : > { %v1688_v21 = vrot.slane %v1685_v3, 6 }
 0x19f   : > { %v1696_v59 = vadd.f32 %v1688_v21, %v309_v8  ;;  %v5712_v8 = vrot.slane %v1238_v35, %v4113_v4 }
 0x1a0   : > { %v1460_v5 = vpop.f32.mrb[8].mxu0 }
 0x1a1   : > { %v1462_v6 = vpop.f32.mrb[9].mxu0  ;;  %v2163_v18 = vrot.slane %v1696_v59, %v5621_v22  ;;  %v5726_v36 = vrot.slane %v1696_v59, %v5624_v24 }
 0x1a2   : > { %v1684_v7 = vcombine.low %v1460_v5, %v1462_v6 }
 0x1a4   : > { %v1687_v58 = vrot.slane %v1684_v7, 6 }
 0x1a6   : > { %v1695_v61 = vadd.f32 %v1687_v58, %v308_v9 }
 0x1a8   : > { %v2155_v48 = vrot.slane %v1695_v61, %v5621_v22  ;;  %v2159_v12 = vrot.slane %v1695_v61, %v5624_v24 }
 0x1bf   : > { %v1673_v42 = vpop.f32.mrb[10].mxu1 }
 0x1c0   : > { %v1690_v49 = vrot.slane %v1673_v42, 6  ;;  %v1675_v50 = vpop.f32.mrb[11].mxu1 }
 0x1c2   : > { %v1698_v5 = vadd.f32 %v1690_v49, %v311_v10 }
 0x1c3   : > { %v1788_v13 = vpop.f32.mrb[12].mxu1 }
 0x1c4   : > { %v2067_v56 = vmul.f32 %v5601_v51, %v1788_v13  ;;  %v2113_v58 = vmul.f32 %v2081_v34, %v1788_v13  ;;  %v2187_v1 = vmul.f32 %v2155_v48, %v1788_v13  ;;  %v1790_v15 = vpop.f32.mrb[13].mxu1  ;;  %v5729_v61 = vrot.slane %v1698_v5, %v5621_v22 }
 0x1c5   : > { %v2068_v17 = vmul.f32 %v5618_v20, %v1790_v15  ;;  %v2114_v53 = vmul.f32 %v2085_v47, %v1790_v15  ;;  %v2188_v4 = vmul.f32 %v2159_v12, %v1790_v15  ;;  %v2229_v16 = vrot.slane %v1788_v13, 3 }
 0x1c6   : > { %v2127_v21 = vrot.slane %v2113_v58, 1  ;;  %v1602_v35 = vpop.f32.mrb[10].mxu0  ;;  %v2201_v41 = vrot.slane %v2187_v1, 2  ;;  %v2230_v50 = vrot.slane %v1790_v15, 3 }
 0x1c7   : > { %v2128_v42 = vrot.slane %v2114_v53, 1  ;;  %v2202_v49 = vrot.slane %v2188_v4, 2  ;;  %v1794_v9 = vpop.f32.mrb[14].mxu1  ;;  %v1604_v23 = vpop.f32.mrb[11].mxu0 }
 0x1c8   : > { %v2141_v10 = vadd.f32 %v2127_v21, %v2067_v56  ;;  %v2250_v7 = vmul.f32 %v5601_v51, %v1794_v9  ;;  %v2257_v6 = vmul.f32 %v2081_v34, %v1794_v9  ;;  %v2292_v3 = vmul.f32 %v2155_v48, %v1794_v9  ;;  %v5732_v2 = vpop.f32.mrb[15].mxu1 }
 0x1c9   : > { %v2142_v59 = vadd.f32 %v2128_v42, %v2068_v17  ;;  %v2334_v60 = vrot.slane %v1794_v9, 3  ;;  %v2251_v5 = vmul.f32 %v5618_v20, %v5732_v2  ;;  %v2258_v13 = vmul.f32 %v2085_v47, %v5732_v2 }
 0x1ca   : > { %v2215_v58 = vadd.f32 %v2201_v41, %v2141_v10  ;;  %v2271_v1 = vrot.slane %v2257_v6, 1  ;;  %v2306_v53 = vrot.slane %v2292_v3, 2  ;;  %v2293_v15 = vmul.f32 %v2159_v12, %v5732_v2 }
 0x1cb   : > { %v2216_v4 = vadd.f32 %v2202_v49, %v2142_v59  ;;  %v2272_v56 = vrot.slane %v2258_v13, 1  ;;  %v2335_v51 = vrot.slane %v5732_v2, 3  ;;  %v1865_v34 = vpop.f32.mrb[16].mxu1  ;;  %v1686_v48 = vcombine.low %v1602_v35, %v1604_v23 }
 0x1cc   : > { %v5739_v21 = vadd.f32 %v2229_v16, %v2215_v58  ;;  %v2285_v17 = vadd.f32 %v2271_v1, %v2250_v7  ;;  %v2307_v9 = vrot.slane %v2293_v15, 2  ;;  %v2069_v42 = vmul.f32 %v5596_v39, %v1865_v34  ;;  %v1867_v20 = vpop.f32.mrb[17].mxu1 }
 0x1cd   : > { %v5742_v52 = vadd.f32 %v2230_v50, %v2216_v4  ;;  %v2286_v47 = vadd.f32 %v2272_v56, %v2251_v5  ;;  %v2115_v3 = vmul.f32 %v5650_v30, %v1865_v34  ;;  %v2189_v6 = vmul.f32 %v2163_v18, %v1865_v34 }
 0x1ce   : > { %v2362_v12 = vrot.slane %v5739_v21, 3  ;;  %v2320_v10 = vadd.f32 %v2306_v53, %v2285_v17  ;;  %v2231_v41 = vrot.slane %v1865_v34, 3  ;;  %v2070_v49 = vmul.f32 %v5598_v40, %v1867_v20 }
 0x1cf   : > { %v2321_v23 = vadd.f32 %v2307_v9, %v2286_v47  ;;  %v2129_v16 = vrot.slane %v2115_v3, 1  ;;  %v2203_v35 = vrot.slane %v2189_v6, 2  ;;  %v2116_v7 = vmul.f32 %v5667_v33, %v1867_v20  ;;  %v1871_v59 = vpop.f32.mrb[18].mxu1 }
 0x1d0   : > { %v5748_v13 = vadd.f32 %v2334_v60, %v2320_v10  ;;  %v2190_v50 = vmul.f32 %v5726_v36, %v1867_v20  ;;  %v2232_v5 = vrot.slane %v1867_v20, 3  ;;  %v1689_v58 = vrot.slane %v1686_v48, 6  ;;  %v5751_v1 = vpop.f32.mrb[19].mxu1 }
 0x1d1   : > { %v2143_v15 = vadd.f32 %v2129_v16, %v2069_v42  ;;  %v2130_v4 = vrot.slane %v2116_v7, 1  ;;  %v2252_v53 = vmul.f32 %v5596_v39, %v1871_v59  ;;  %v2259_v56 = vmul.f32 %v5650_v30, %v1871_v59 }
 0x1d2   : > { %v2204_v34 = vrot.slane %v2190_v50, 2  ;;  %v1697_v17 = vadd.f32 %v1689_v58, %v5570_v11  ;;  %v2294_v9 = vmul.f32 %v2163_v18, %v1871_v59  ;;  %v2336_v47 = vrot.slane %v1871_v59, 3 }
 0x1d3   : > { %v2217_v3 = vadd.f32 %v2203_v35, %v2143_v15  ;;  %v2144_v60 = vadd.f32 %v2130_v4, %v2070_v49  ;;  %v2273_v6 = vrot.slane %v2259_v56, 1  ;;  %v2253_v20 = vmul.f32 %v5598_v40, %v5751_v1  ;;  %v1942_v48 = vpop.f32.mrb[20].mxu1 }
 0x1d4   : > { %v2171_v42 = vrot.slane %v1697_v17, %v5621_v22  ;;  %v2175_v10 = vrot.slane %v1697_v17, %v5624_v24  ;;  %v2308_v39 = vrot.slane %v2294_v9, 2  ;;  %v2260_v30 = vmul.f32 %v5667_v33, %v5751_v1  ;;  %v1944_v16 = vpop.f32.mrb[21].mxu1 }
 0x1d5   : > { %v5762_v11 = vadd.f32 %v2231_v41, %v2217_v3  ;;  %v2218_v18 = vadd.f32 %v2204_v34, %v2144_v60  ;;  %v2287_v35 = vadd.f32 %v2273_v6, %v2252_v53  ;;  %v2295_v49 = vmul.f32 %v5726_v36, %v5751_v1 }
 0x1d6   : > { %v2274_v7 = vrot.slane %v2260_v30, 1  ;;  %v2337_v40 = vrot.slane %v5751_v1, 3  ;;  %v2071_v59 = vmul.f32 %v5645_v55, %v1942_v48  ;;  %v2117_v22 = vmul.f32 %v5715_v62, %v1942_v48 }
 0x1d7   : > { %v2364_v24 = vrot.slane %v5762_v11, 3  ;;  %v5770_v50 = vadd.f32 %v2232_v5, %v2218_v18  ;;  %v2322_v33 = vadd.f32 %v2308_v39, %v2287_v35  ;;  %v2309_v58 = vrot.slane %v2295_v49, 2  ;;  %v5772_v41 = vpop.f32.mrb[22].mxu1 }
 0x1d8   : > { %v2288_v15 = vadd.f32 %v2274_v7, %v2253_v20  ;;  %v2131_v4 = vrot.slane %v2117_v22, 1  ;;  %v2191_v53 = vmul.f32 %v2171_v42, %v1942_v48  ;;  %v2233_v36 = vrot.slane %v1942_v48, 3  ;;  %v5774_v56 = vpop.f32.mrb[23].mxu1 }
 0x1d9   : > { %v5776_v34 = vadd.f32 %v2336_v47, %v2322_v33  ;;  %v2072_v17 = vmul.f32 %v5647_v29, %v1944_v16  ;;  %v2118_v9 = vmul.f32 %v5720_v14, %v1944_v16  ;;  %v2192_v3 = vmul.f32 %v2175_v10, %v1944_v16 }
 0x1da   : > { %v2323_v5 = vadd.f32 %v2309_v58, %v2288_v15  ;;  %v2145_v60 = vadd.f32 %v2131_v4, %v2071_v59  ;;  %v2205_v6 = vrot.slane %v2191_v53, 2  ;;  %v2234_v39 = vrot.slane %v1944_v16, 3 }
 0x1db   : > { %v2132_v30 = vrot.slane %v2118_v9, 1  ;;  %v2206_v18 = vrot.slane %v2192_v3, 2  ;;  %v2349_v20 = vadd.f32 %v2335_v51, %v2321_v23  ;;  %v2363_v48 = vrot.slane %v5742_v52, 3  ;;  %v5784_v35 = vpop.f32.mrb[24].mxu1 }
 0x1dc   : > { %v2219_v47 = vadd.f32 %v2205_v6, %v2145_v60  ;;  %v2383_v49 = vrot.slane %v5748_v13, 6  ;;  %v2397_v7 = vsel %vm458_vm1, %v5739_v21, %v2362_v12  ;;  %v2254_v16 = vmul.f32 %v5645_v55, %v5772_v41  ;;  %v5793_v59 = vpop.f32.mrb[25].mxu1 }
 0x1dd   : > { %v2146_v22 = vadd.f32 %v2132_v30, %v2072_v17  ;;  %v2384_v2 = vrot.slane %v2349_v20, 6  ;;  %v2398_v51 = vsel %vm458_vm1, %v5742_v52, %v2363_v48  ;;  %v2261_v23 = vmul.f32 %v5715_v62, %v5772_v41 }
 0x1de   : > { %v5799_v33 = vadd.f32 %v2233_v36, %v2219_v47  ;;  %v2405_v13 = vsel %vm2404_vm3, %v2397_v7, %v2383_v49  ;;  %v2296_v58 = vmul.f32 %v2171_v42, %v5772_v41  ;;  %v2338_v21 = vrot.slane %v5772_v41, 3 }
 0x1df   : > { %v2220_v12 = vadd.f32 %v2206_v18, %v2146_v22  ;;  %v2406_v55 = vsel %vm2404_vm3, %v2398_v51, %v2384_v2  ;;  %v2275_v52 = vrot.slane %v2261_v23, 1  ;;  %v2255_v62 = vmul.f32 %v5647_v29, %v5774_v56 }
 0x1e0   : > { %v2366_v15 = vrot.slane %v5799_v33, 3  ;;  %v2419_v4 = vcombine.low %v2405_v13, %v2406_v55  ;;  %2598 = vmatprep.mubr.f32.mxu0 %v2406_v55  ;;  %v2310_v42 = vrot.slane %v2296_v58, 2  ;;  %v2262_v41 = vmul.f32 %v5720_v14, %v5774_v56 }
 0x1e1   : > { %v2248_v53 = vadd.f32 %v2234_v39, %v2220_v12  ;;  %v2289_v36 = vadd.f32 %v2275_v52, %v2254_v16  ;;  %2599 = vmatmul.mubr.f32.vlgmr.msra.gmra.mrb[12].mxu0 %v2405_v13  ;;  %v2297_v17 = vmul.f32 %v2175_v10, %v5774_v56  ;;  %v2339_v9 = vrot.slane %v5774_v56, 3 }
 0x1e2   : > { %2425 = vst [vmem:[%s5807_s29] sm:$0x77] %v2419_v4  ;;  %v5951_v3 = vpack.c.bf16 %v5593_v38, %v5588_v37  ;;  %v2276_v29 = vrot.slane %v2262_v41, 1  ;;  %v2256_v60 = vmul.f32 %v5784_v35, %v5642_v28  ;;  %v2263_v6 = vmul.f32 %v5784_v35, %v5712_v8  ;;  %v2521_v41 = vld [vmem:[%s5946_s5 + $0x2d8] sm:$0xff] }
 0x1e3   : > { %v2298_v14 = vmul.f32 %v5784_v35, %v5729_v61  ;;  %v2324_v39 = vadd.f32 %v2310_v42, %v2289_v36  ;;  %v2311_v30 = vrot.slane %v2297_v17, 2  ;;  %v5952_v10 = vpack.c.bf16 %v5611_v0, %v5606_v63  ;;  %v2502_v42 = vld [vmem:[%s5946_s5 + $0x240] sm:$0xff] }
 0x1e4   : > { %3850 = vmatpush3.bf16.msra.mxu0 %v5951_v3  ;;  %v2340_v56 = vrot.slane %v5784_v35, 3  ;;  %v2073_v37 = vmul.f32 %v5642_v28, %v5793_v59  ;;  %v2290_v38 = vadd.f32 %v2276_v29, %v2255_v62  ;;  %v2277_v18 = vrot.slane %v2263_v6, 1  ;;  %v2504_v29 = vld [vmem:[%s5946_s5 + $0x250] sm:$0xff] }
 0x1e5   : > { %3852 = vmatprep.subr.bf16.mxu0 %v5952_v10  ;;  %v2312_v20 = vrot.slane %v2298_v14, 2  ;;  %v2119_v48 = vmul.f32 %v5712_v8, %v5793_v59  ;;  %v2352_v47 = vadd.f32 %v2338_v21, %v2324_v39  ;;  %v2193_v49 = vmul.f32 %v5729_v61, %v5793_v59  ;;  %v2506_v10 = vld [vmem:[%s5946_s5 + $0x260] sm:$0xff] }
 0x1e6   : > { %v2235_v7 = vrot.slane %v5793_v59, 3  ;;  %v2351_v63 = vadd.f32 %v2337_v40, %v2323_v5  ;;  %v2325_v0 = vadd.f32 %v2311_v30, %v2290_v38  ;;  %v2291_v35 = vadd.f32 %v2277_v18, %v2256_v60  ;;  %v2505_v60 = vld [vmem:[%s5946_s5 + $0x258] sm:$0xff] }
 0x1e7   : > { %v5953_v28 = vpack.c.bf16 %v5629_v25, %v5616_v19  ;;  %v2133_v16 = vrot.slane %v2119_v48, 1  ;;  %v2365_v22 = vrot.slane %v5770_v50, 3  ;;  %v2207_v2 = vrot.slane %v2193_v49, 2  ;;  %v2518_v25 = vld [vmem:[%s5946_s5 + $0x2c0] sm:$0xff]  ;;  %v2525_v38 = vld [vmem:[%s5946_s5 + $0x2f8] sm:$0xff]  ;;  %v2508_v48 = vld [vmem:[%s5946_s5 + $0x270] sm:$0xff] }
 0x1e8   : > { %v2385_v8 = vrot.slane %v5776_v34, 6  ;;  %v2386_v51 = vrot.slane %v2351_v63, 6  ;;  %v2399_v61 = vsel %vm458_vm1, %v5762_v11, %v2364_v24  ;;  %v5954_v1 = vpack.c.bf16 %v5639_v27, %v5634_v26  ;;  %v2519_v34 = vld [vmem:[%s5946_s5 + $0x2c8] sm:$0xff] }
 0x1e9   : > { %3854 = vmatpush3.bf16.msra.mxu0 %v5953_v28  ;;  %v2326_v40 = vadd.f32 %v2312_v20, %v2291_v35  ;;  %v2147_v5 = vadd.f32 %v2133_v16, %v2073_v37  ;;  %v2400_v19 = vsel %vm458_vm1, %v5770_v50, %v2365_v22  ;;  %v2353_v59 = vadd.f32 %v2339_v9, %v2325_v0  ;;  %v2524_v37 = vld [vmem:[%s5946_s5 + $0x2f0] sm:$0xff] }
 0x1ea   : > { %3856 = vmatprep.subr.bf16.mxu0 %v5954_v1  ;;  %v2407_v11 = vsel %vm2404_vm3, %v2399_v61, %v2385_v8  ;;  %v2408_v24 = vsel %vm2404_vm3, %v2400_v19, %v2386_v51  ;;  %v2367_v26 = vrot.slane %v2248_v53, 3  ;;  %v2387_v27 = vrot.slane %v2352_v47, 6  ;;  %v2509_v47 = vld [vmem:[%s5946_s5 + $0x278] sm:$0xff] }
 0x1eb   : > { %v2354_v23 = vadd.f32 %v2340_v56, %v2326_v40  ;;  %v2221_v13 = vadd.f32 %v2207_v2, %v2147_v5  ;;  %v2420_v58 = vcombine.low %v2407_v11, %v2408_v24  ;;  %2668 = vmatprep.mubr.f32.mxu1 %v2408_v24  ;;  %v5957_v21 = vpack.c.bf16 %v5660_v32, %v5655_v31  ;;  %v2503_v31 = vld [vmem:[%s5946_s5 + $0x248] sm:$0xff] }
 0x1ec   : > { %v2388_v12 = vrot.slane %v2353_v59, 6  ;;  %2669 = vmatmul.mubr.f32.vlgmr.msra.gmra.mrb[26].mxu1 %v2407_v11  ;;  %v5958_v55 = vpack.c.bf16 %v5674_v43, %v5665_v44  ;;  %v3863_v52 = vpack.c.bf16 %v2519_v34, %v2518_v25  ;;  %v2401_v62 = vsel %vm458_vm1, %v5799_v33, %v2366_v15  ;;  %v2520_v15 = vld [vmem:[%s5946_s5 + $0x2d0] sm:$0xff]  ;;  %v2507_v56 = vld [vmem:[%s5946_s5 + $0x268] sm:$0xff] }
 0x1ed   : > { %3858 = vmatpush3.bf16.msra.mxu0 %v5957_v21  ;;  %v2402_v4 = vsel %vm458_vm1, %v2248_v53, %v2367_v26  ;;  %v2249_v32 = vadd.f32 %v2235_v7, %v2221_v13  ;;  %2426 = vst [vmem:[%s5807_s29 + $0x8] sm:$0x77] %v2420_v58  ;;  %v2409_v44 = vsel %vm2404_vm3, %v2401_v62, %v2387_v27  ;;  %v5960_v53 = vmov 0.0  }
 0x1ee   : > { %3860 = vmatprep.subr.bf16.mxu0 %v5958_v55  ;;  %v2410_v43 = vsel %vm2404_vm3, %v2402_v4, %v2388_v12  ;;  %v5959_v33 = vpack.c.bf16 %v5697_v57, %v5692_v54  ;;  %3359 = vmatprep.mubr.msk.f32.mxu1 %vm3907_vm6, %v5960_v53  ;;  %v5961_v54 = vpack.c.bf16 %v5684_v46, %v5679_v45  ;;  %v2389_v9 = vrot.slane %v2354_v23, 6  ;;  %v2522_v45 = vld [vmem:[%s5946_s5 + $0x2e0] sm:$0xff]  ;;  %v2523_v46 = vld [vmem:[%s5946_s5 + $0x2e8] sm:$0xff] }
 0x1ef   : > { %v2421_v36 = vcombine.low %v2409_v44, %v2410_v43  ;;  %2738 = vmatprep.mubr.f32.mxu0 %v2410_v43  ;;  %v2368_v17 = vrot.slane %v2249_v32, 3  ;;  %v3865_v57 = vpack.c.bf16 %v2503_v31, %v2502_v42  ;;  %v3867_v3 = vpack.c.bf16 %v2521_v41, %v2520_v15 }
 0x1f0   : > { %3882 = vmatpush3.bf16.msk.msra.mxu1 %vm5863_vm5, %v5959_v33  ;;  %v3869_v39 = vpack.c.bf16 %v2505_v60, %v2504_v29  ;;  %v3871_v30 = vpack.c.bf16 %v2523_v46, %v2522_v45  ;;  %v3873_v18 = vpack.c.bf16 %v2507_v56, %v2506_v10  ;;  %v3875_v20 = vpack.c.bf16 %v2525_v38, %v2524_v37 }
 0x1f1   : > { %3862 = vmatpush3.bf16.msra.mxu0 %v5961_v54  ;;  %2427 = vst [vmem:[%s5807_s29 + $0x10] sm:$0x77] %v2421_v36  ;;  %v2403_v6 = vsel %vm458_vm1, %v2249_v32, %v2368_v17  ;;  %v3877_v49 = vpack.c.bf16 %v2509_v47, %v2508_v48 }
 0x1f2   : > { %3864 = vmatprep.subr.bf16.mxu0 %v3863_v52  ;;  %v2411_v14 = vsel %vm2404_vm3, %v2403_v6, %v2389_v9 }
 0x1f3   : > { %2429 = vst.msk [vmem:[%s5807_s29 + $0x18] sm:$0x7] %vm2428_vm7, %v2411_v14  ;;  %3360 = vmatmul.mubr.msk.f32.vlgmr.msra.gmra.mrb[28].mxu1 %vm2528_vm8, %v2411_v14 }
 0x1f5   : > { %3866 = vmatpush3.bf16.msra.mxu0 %v3865_v57 }
 0x1f6   : > { %3868 = vmatprep.subr.bf16.mxu0 %v3867_v3 }
 0x1f9   : > { %3870 = vmatpush3.bf16.msra.mxu0 %v3869_v39 }
 0x1fa   : > { %3872 = vmatprep.subr.bf16.mxu0 %v3871_v30 }
 0x1fd   : > { %3874 = vmatpush3.bf16.msra.mxu0 %v3873_v18 }
 0x1fe   : > { %3876 = vmatprep.subr.bf16.mxu0 %v3875_v20 }
 0x201   : > { %3878 = vmatpush3.bf16.msra.mxu0 %v3877_v49 }
 0x204   : > { %2739 = vmatmul.mubr.f32.vlgmr.msra.gmra.mrb[14].mxu0 %v2409_v44 }
 0x2b4   : > { %v3272_v7 = vpop.f32.mrb[12].mxu0 }
 0x2b5   : > { %v3273_v63 = vpop.f32.mrb[13].mxu0 }
 0x2b6   : > { %v3274_v0 = vadd.f32 %v3273_v63, %v3272_v7 }
 0x2bf   : > { %v3307_v35 = vpop.f32.mrb[26].mxu1 }
 0x2c0   : > { %v3308_v28 = vpop.f32.mrb[27].mxu1 }
 0x2c1   : > { %v3309_v16 = vadd.f32 %v3308_v28, %v3307_v35 }
 0x2c3   : > { %v2671_v22 = vadd.f32 %v3309_v16, %v3274_v0 }
 0x2c6   : > { %v2810_v2 = vpop.f32.mrb[28].mxu1 }
 0x2c7   : > { %v3361_v8 = vpop.f32.mrb[29].mxu1 }
 0x2d7   : > { %v3342_v51 = vpop.f32.mrb[14].mxu0 }
 0x2d8   : > { %v3343_v61 = vpop.f32.mrb[15].mxu0 }
 0x2d9   : > { %v3344_v1 = vadd.f32 %v3343_v61, %v3342_v51 }
 0x2db   : > { %v2741_v40 = vadd.f32 %v3344_v1, %v2671_v22 }
 0x2dd   : > { %v2811_v5 = vadd.f32 %v2810_v2, %v2741_v40 }
 0x2df   : > { %2815 = vst.msk [vmem:[%s306_s20] sm:$0x7] %vm2814_vm9, %v2811_v5 }
 0x2e0 PF: > { %s18_s24 = sadd.s32 1, %s3902_s24  }
 0x2e1   : > { %p15_p4 = scmp.ge.s32.totalorder %s18_s24, 4  }
 0x2e3   :  { %17 = sbr.rel (!%p15_p4) target bundleno = 1 (0x1), region = 91 }

</bundles_post_ra>
